<compile_context>
chip_gen: v7x
topology: tpu7x:2x2x1
jax: 0.10.0
libtpu: 0.0.40
codegen_flags: <defaults>
</compile_context>

<pallas_src>
import functools
import math

import jax
import jax.numpy as jnp
from jax import lax
from jax.experimental import pallas as pl
from jax.experimental.pallas import tpu as pltpu

EPS = 1e-6
NEG_INF = -1e9


# --------------------------------------------------------------------------
# In-kernel helpers (traced inside the Pallas kernel)
# --------------------------------------------------------------------------
def _layernorm(x, gamma, beta):
    """torch-style LayerNorm: unbiased std (ddof=1), divide by (std + eps)."""
    mean = jnp.mean(x, axis=-1, keepdims=True)
    diff = x - mean
    var = jnp.sum(diff * diff, axis=-1, keepdims=True) / (x.shape[-1] - 1)
    std = jnp.sqrt(var)
    return gamma * diff / (std + EPS) + beta


def _attention(q, k, v, bias, ctx_ref, n_heads):
    """Multi-head attention core for one batch element.

    q: (Sq, D) f32 with 1/sqrt(dk) already folded into the Q projection.
    k, v: (Sk, D) f32.  bias: (Sq|1, Sk) f32 additive mask (0 or -1e9).
    Writes each head's context directly into ctx_ref (VMEM, (Sq, D) f32).
    """
    D = q.shape[-1]
    dk = D // n_heads
    qb = q.astype(jnp.bfloat16)
    kb = k.astype(jnp.bfloat16)
    vb = v.astype(jnp.bfloat16)
    for h in range(n_heads):
        sl = slice(h * dk, (h + 1) * dk)
        # contract last dims directly -> no explicit transpose of K
        s = lax.dot_general(qb[:, sl], kb[:, sl], (((1,), (1,)), ((), ())),
                            preferred_element_type=jnp.float32)      # (Sq, Sk) f32
        s = s + bias                                                  # additive mask
        m = jnp.max(s, axis=-1, keepdims=True)
        p = jnp.exp(s - m)
        p = p * pl.reciprocal(jnp.sum(p, axis=-1, keepdims=True), approx=True)
        ctx_ref[:, sl] = jnp.dot(p.astype(jnp.bfloat16), vb[:, sl],
                                 preferred_element_type=jnp.float32)


# --------------------------------------------------------------------------
# Fused decoder-layer kernel (one pallas_call per layer, grid over batch)
# --------------------------------------------------------------------------
def decoder_layer_kernel(x_ref, mem_ref, tbias_ref, sbias_ref,
                         ln0g_ref, ln0b_ref,
                         sa_wqkv_ref, sa_bqkv_ref, sa_wo_ref, sa_bo_ref,
                         ln1g_ref, ln1b_ref,
                         ca_wq_ref, ca_bq_ref, ca_wkv_ref, ca_bkv_ref,
                         ca_wo_ref, ca_bo_ref,
                         ln2g_ref, ln2b_ref,
                         w1_ref, b1_ref, w2_ref, b2_ref,
                         o_ref, ctx_ref, *, n_heads):
    D = x_ref.shape[-1]
    x = x_ref[0]                                          # (Sq, D) f32
    mem = mem_ref[0]                                      # (Sk, D) f32

    # ---- sublayer 0: x + self_attn(norm(x), norm(x), norm(x), tgt_mask) ----
    xn = _layernorm(x, ln0g_ref[...], ln0b_ref[...])
    qkv = jnp.dot(xn.astype(jnp.bfloat16), sa_wqkv_ref[...],
                  preferred_element_type=jnp.float32) + sa_bqkv_ref[...]
    _attention(qkv[:, :D], qkv[:, D:2 * D], qkv[:, 2 * D:], tbias_ref[0],
               ctx_ref, n_heads)
    attn = jnp.dot(ctx_ref[...].astype(jnp.bfloat16), sa_wo_ref[...],
                   preferred_element_type=jnp.float32) + sa_bo_ref[...]
    x = x + attn                                          # residual (stays in vregs)

    # ---- sublayer 1: x + src_attn(norm(x), memory, memory, src_mask) ----
    xn = _layernorm(x, ln1g_ref[...], ln1b_ref[...])
    q = jnp.dot(xn.astype(jnp.bfloat16), ca_wq_ref[...],
                preferred_element_type=jnp.float32) + ca_bq_ref[...]
    kv = jnp.dot(mem.astype(jnp.bfloat16), ca_wkv_ref[...],
                 preferred_element_type=jnp.float32) + ca_bkv_ref[...]
    _attention(q, kv[:, :D], kv[:, D:], sbias_ref[0], ctx_ref, n_heads)
    attn = jnp.dot(ctx_ref[...].astype(jnp.bfloat16), ca_wo_ref[...],
                   preferred_element_type=jnp.float32) + ca_bo_ref[...]
    x = x + attn

    # ---- sublayer 2: x + feed_forward(norm(x)) ----
    xn = _layernorm(x, ln2g_ref[...], ln2b_ref[...])
    h = jnp.dot(xn.astype(jnp.bfloat16), w1_ref[...],
                preferred_element_type=jnp.float32) + b1_ref[...]
    h = jnp.maximum(h, 0.0)                               # ReLU
    y = jnp.dot(h.astype(jnp.bfloat16), w2_ref[...],
                preferred_element_type=jnp.float32) + b2_ref[...]
    o_ref[0] = x + y


# --------------------------------------------------------------------------
# Wrapper: one pallas_call, batch-parallel grid, weights resident
# --------------------------------------------------------------------------
def _resident(shape):
    nd = len(shape)
    return pl.BlockSpec(shape, lambda b, _nd=nd: (0,) * _nd)


def _batched(trailing):
    nz = len(trailing)
    return pl.BlockSpec((1,) + tuple(trailing), lambda b, _nz=nz: (b,) + (0,) * _nz)


def decoder_layer(x, memory, src_mask, tgt_mask, params, n_heads):
    B, Sq, D = x.shape
    Sk = memory.shape[1]
    d_ff = params["w1"].shape[1]

    # additive mask bias precomputed once per call (no in-kernel compare/select,
    # 0/-1e9 f32 is also smaller DMA than broadcasting int32 per head)
    tgt_bias = jnp.where(tgt_mask == 0, NEG_INF, 0.0).astype(jnp.float32)
    src_bias = jnp.where(src_mask == 0, NEG_INF, 0.0).astype(jnp.float32)

    kern = functools.partial(decoder_layer_kernel, n_heads=n_heads)
    return pl.pallas_call(
        kern,
        grid=(B,),
        in_specs=[
            _batched((Sq, D)),                                    # x
            _batched((Sk, D)),                                    # memory
            _batched((tgt_bias.shape[1], tgt_bias.shape[2])),     # tgt mask bias
            _batched((src_bias.shape[1], src_bias.shape[2])),     # src mask bias
            _resident((1, D)), _resident((1, D)),                 # ln0 gamma/beta
            _resident((D, 3 * D)), _resident((1, 3 * D)),         # self-attn wqkv/bqkv
            _resident((D, D)), _resident((1, D)),                 # self-attn wo/bo
            _resident((1, D)), _resident((1, D)),                 # ln1 gamma/beta
            _resident((D, D)), _resident((1, D)),                 # src-attn wq/bq
            _resident((D, 2 * D)), _resident((1, 2 * D)),         # src-attn wkv/bkv
            _resident((D, D)), _resident((1, D)),                 # src-attn wo/bo
            _resident((1, D)), _resident((1, D)),                 # ln2 gamma/beta
            _resident((D, d_ff)), _resident((1, d_ff)),           # ffn w1/b1
            _resident((d_ff, D)), _resident((1, D)),              # ffn w2/b2
        ],
        out_specs=_batched((Sq, D)),
        out_shape=jax.ShapeDtypeStruct((B, Sq, D), jnp.float32),
        scratch_shapes=[pltpu.VMEM((Sq, D), jnp.float32)],        # per-head ctx slab
        compiler_params=pltpu.CompilerParams(
            dimension_semantics=("parallel",),
            vmem_limit_bytes=32 * 1024 * 1024),
    )(
        x, memory, tgt_bias, src_bias,
        params["ln0_g"], params["ln0_b"],
        params["sa_wqkv"], params["sa_bqkv"], params["sa_wo"], params["sa_bo"],
        params["ln1_g"], params["ln1_b"],
        params["ca_wq"], params["ca_bq"], params["ca_wkv"], params["ca_bkv"],
        params["ca_wo"], params["ca_bo"],
        params["ln2_g"], params["ln2_b"],
        params["w1"], params["b1"], params["w2"], params["b2"],
    )


# --------------------------------------------------------------------------
# Deterministic parameter construction (bf16 weights, 1/sqrt(dk) pre-folded)
# --------------------------------------------------------------------------
def init_params(key, d_model, d_ff, n_heads):
    dk = d_model // n_heads
    scale = 1.0 / math.sqrt(dk)
    ks = jax.random.split(key, 10)
    mk = lambda k, shp: jax.random.normal(k, shp, jnp.float32) * 0.02

    # self-attention: fused (D, 3D) QKV weight, scale folded into the Q block
    wq_s, wk_s, wv_s, wo_s = (mk(ks[i], (d_model, d_model)) for i in range(4))
    # src-attention: separate Q proj (scale folded) and fused (D, 2D) KV proj
    wq_c, wk_c, wv_c, wo_c = (mk(ks[4 + i], (d_model, d_model)) for i in range(4))
    w1 = mk(ks[8], (d_model, d_ff))
    w2 = mk(ks[9], (d_ff, d_model))

    zD = jnp.zeros((1, d_model), jnp.float32)
    return {
        "ln0_g": jnp.ones((1, d_model), jnp.float32), "ln0_b": zD,
        "ln1_g": jnp.ones((1, d_model), jnp.float32), "ln1_b": zD,
        "ln2_g": jnp.ones((1, d_model), jnp.float32), "ln2_b": zD,
        "sa_wqkv": jnp.concatenate([wq_s * scale, wk_s, wv_s], axis=1
                                   ).astype(jnp.bfloat16),
        "sa_bqkv": jnp.zeros((1, 3 * d_model), jnp.float32),   # scale-folded (zeros)
        "sa_wo": wo_s.astype(jnp.bfloat16), "sa_bo": zD,
        "ca_wq": (wq_c * scale).astype(jnp.bfloat16), "ca_bq": zD,
        "ca_wkv": jnp.concatenate([wk_c, wv_c], axis=1).astype(jnp.bfloat16),
        "ca_bkv": jnp.zeros((1, 2 * d_model), jnp.float32),
        "ca_wo": wo_c.astype(jnp.bfloat16), "ca_bo": zD,
        "w1": w1.astype(jnp.bfloat16), "b1": jnp.zeros((1, d_ff), jnp.float32),
        "w2": w2.astype(jnp.bfloat16), "b2": zD,
    }


if __name__ == "__main__":
    # lane-dense demo shape: d_model = 128 (full lane width), seq = 8 (sublane)
    B, Sq, Ssrc, D, H, D_FF = 2, 8, 8, 128, 4, 256

    key = jax.random.PRNGKey(0)
    k_x, k_m, k_p = jax.random.split(key, 3)

    x = jax.random.normal(k_x, (B, Sq, D), jnp.float32)
    memory = jax.random.normal(k_m, (B, Ssrc, D), jnp.float32)

    # Annotated-Transformer mask conventions:
    #   tgt_mask: (B, Sq, Sq) causal; src_mask: (B, 1, Ssrc) padding mask
    tgt_mask = jnp.broadcast_to(
        jnp.tril(jnp.ones((Sq, Sq), jnp.int32))[None, :, :], (B, Sq, Sq))
    src_lens = jnp.array([Ssrc, Ssrc - 2], jnp.int32)
    src_mask = (jnp.arange(Ssrc)[None, None, :] < src_lens[:, None, None]
                ).astype(jnp.int32)

    params = init_params(k_p, D, D_FF, H)

    layer = jax.jit(functools.partial(decoder_layer, n_heads=H))
    out = layer(x, memory, src_mask, tgt_mask, params)
    out = jax.block_until_ready(out)

    assert out.shape == (B, Sq, D) and out.dtype == jnp.float32
    assert bool(jnp.all(jnp.isfinite(out)))
    print("KERNEL_OK")
</pallas_src>

<mosaic_0001>
module attributes {stable_mosaic.version = 11 : i64} {
  func.func @decoder_layer_kernel(%arg0: i32, %arg1: memref<1x8x128xf32, #tpu.memory_space<vmem>>, %arg2: memref<1x8x128xf32, #tpu.memory_space<vmem>>, %arg3: memref<1x8x8xf32, #tpu.memory_space<vmem>>, %arg4: memref<1x1x8xf32, #tpu.memory_space<vmem>>, %arg5: memref<1x128xf32, #tpu.memory_space<vmem>>, %arg6: memref<1x128xf32, #tpu.memory_space<vmem>>, %arg7: memref<128x384xbf16, #tpu.memory_space<vmem>>, %arg8: memref<1x384xf32, #tpu.memory_space<vmem>>, %arg9: memref<128x128xbf16, #tpu.memory_space<vmem>>, %arg10: memref<1x128xf32, #tpu.memory_space<vmem>>, %arg11: memref<1x128xf32, #tpu.memory_space<vmem>>, %arg12: memref<1x128xf32, #tpu.memory_space<vmem>>, %arg13: memref<128x128xbf16, #tpu.memory_space<vmem>>, %arg14: memref<1x128xf32, #tpu.memory_space<vmem>>, %arg15: memref<128x256xbf16, #tpu.memory_space<vmem>>, %arg16: memref<1x256xf32, #tpu.memory_space<vmem>>, %arg17: memref<128x128xbf16, #tpu.memory_space<vmem>>, %arg18: memref<1x128xf32, #tpu.memory_space<vmem>>, %arg19: memref<1x128xf32, #tpu.memory_space<vmem>>, %arg20: memref<1x128xf32, #tpu.memory_space<vmem>>, %arg21: memref<128x256xbf16, #tpu.memory_space<vmem>>, %arg22: memref<1x256xf32, #tpu.memory_space<vmem>>, %arg23: memref<256x128xbf16, #tpu.memory_space<vmem>>, %arg24: memref<1x128xf32, #tpu.memory_space<vmem>>, %arg25: memref<1x8x128xf32, #tpu.memory_space<vmem>>, %arg26: memref<8x128xf32, #tpu.memory_space<vmem>>) attributes {dimension_semantics = [#tpu.dimension_semantics<parallel>], iteration_bounds = array<i64: 2>, scalar_prefetch = 0 : i64, scratch_operands = 1 : i64, tpu.core_type = #tpu.core_type<tc>, window_params = [{transform_indices = @transform_0, window_bounds = array<i64: 1, 8, 128>}, {transform_indices = @transform_1, window_bounds = array<i64: 1, 8, 128>}, {transform_indices = @transform_2, window_bounds = array<i64: 1, 8, 8>}, {transform_indices = @transform_3, window_bounds = array<i64: 1, 1, 8>}, {pipeline_mode = #tpu.pipeline_mode<synchronous>, transform_indices = @transform_4, window_bounds = array<i64: 1, 128>}, {pipeline_mode = #tpu.pipeline_mode<synchronous>, transform_indices = @transform_5, window_bounds = array<i64: 1, 128>}, {pipeline_mode = #tpu.pipeline_mode<synchronous>, transform_indices = @transform_6, window_bounds = array<i64: 128, 384>}, {pipeline_mode = #tpu.pipeline_mode<synchronous>, transform_indices = @transform_7, window_bounds = array<i64: 1, 384>}, {pipeline_mode = #tpu.pipeline_mode<synchronous>, transform_indices = @transform_8, window_bounds = array<i64: 128, 128>}, {pipeline_mode = #tpu.pipeline_mode<synchronous>, transform_indices = @transform_9, window_bounds = array<i64: 1, 128>}, {pipeline_mode = #tpu.pipeline_mode<synchronous>, transform_indices = @transform_10, window_bounds = array<i64: 1, 128>}, {pipeline_mode = #tpu.pipeline_mode<synchronous>, transform_indices = @transform_11, window_bounds = array<i64: 1, 128>}, {pipeline_mode = #tpu.pipeline_mode<synchronous>, transform_indices = @transform_12, window_bounds = array<i64: 128, 128>}, {pipeline_mode = #tpu.pipeline_mode<synchronous>, transform_indices = @transform_13, window_bounds = array<i64: 1, 128>}, {pipeline_mode = #tpu.pipeline_mode<synchronous>, transform_indices = @transform_14, window_bounds = array<i64: 128, 256>}, {pipeline_mode = #tpu.pipeline_mode<synchronous>, transform_indices = @transform_15, window_bounds = array<i64: 1, 256>}, {pipeline_mode = #tpu.pipeline_mode<synchronous>, transform_indices = @transform_16, window_bounds = array<i64: 128, 128>}, {pipeline_mode = #tpu.pipeline_mode<synchronous>, transform_indices = @transform_17, window_bounds = array<i64: 1, 128>}, {pipeline_mode = #tpu.pipeline_mode<synchronous>, transform_indices = @transform_18, window_bounds = array<i64: 1, 128>}, {pipeline_mode = #tpu.pipeline_mode<synchronous>, transform_indices = @transform_19, window_bounds = array<i64: 1, 128>}, {pipeline_mode = #tpu.pipeline_mode<synchronous>, transform_indices = @transform_20, window_bounds = array<i64: 128, 256>}, {pipeline_mode = #tpu.pipeline_mode<synchronous>, transform_indices = @transform_21, window_bounds = array<i64: 1, 256>}, {pipeline_mode = #tpu.pipeline_mode<synchronous>, transform_indices = @transform_22, window_bounds = array<i64: 256, 128>}, {pipeline_mode = #tpu.pipeline_mode<synchronous>, transform_indices = @transform_23, window_bounds = array<i64: 1, 128>}, {transform_indices = @transform_24, window_bounds = array<i64: 1, 8, 128>}]} {
    %c0 = arith.constant 0 : index
    %c0_0 = arith.constant 0 : index
    %c0_1 = arith.constant 0 : index
    %0 = vector.load %arg1[%c0, %c0_0, %c0_1] : memref<1x8x128xf32, #tpu.memory_space<vmem>>, vector<1x8x128xf32>
    %1 = vector.shape_cast %0 : vector<1x8x128xf32> to vector<8x128xf32>
    %c0_2 = arith.constant 0 : index
    %c0_3 = arith.constant 0 : index
    %c0_4 = arith.constant 0 : index
    %2 = vector.load %arg2[%c0_2, %c0_3, %c0_4] : memref<1x8x128xf32, #tpu.memory_space<vmem>>, vector<1x8x128xf32>
    %3 = vector.shape_cast %2 : vector<1x8x128xf32> to vector<8x128xf32>
    %c0_5 = arith.constant 0 : index
    %c0_6 = arith.constant 0 : index
    %4 = vector.load %arg5[%c0_5, %c0_6] : memref<1x128xf32, #tpu.memory_space<vmem>>, vector<1x128xf32>
    %c0_7 = arith.constant 0 : index
    %c0_8 = arith.constant 0 : index
    %5 = vector.load %arg6[%c0_7, %c0_8] : memref<1x128xf32, #tpu.memory_space<vmem>>, vector<1x128xf32>
    %cst = arith.constant dense<0.000000e+00> : vector<8xf32>
    %6 = vector.multi_reduction <add>, %1, %cst [1] : vector<8x128xf32> to vector<8xf32>
    %7 = vector.shape_cast %6 : vector<8xf32> to vector<8x1xf32>
    %cst_9 = arith.constant 1.280000e+02 : f32
    %8 = vector.broadcast %cst_9 : f32 to vector<8x1xf32>
    %9 = arith.divf %7, %8 : vector<8x1xf32>
    %10 = vector.broadcast %9 : vector<8x1xf32> to vector<8x128xf32>
    %11 = arith.subf %1, %10 : vector<8x128xf32>
    %12 = arith.mulf %11, %11 : vector<8x128xf32>
    %cst_10 = arith.constant dense<0.000000e+00> : vector<8xf32>
    %13 = vector.multi_reduction <add>, %12, %cst_10 [1] : vector<8x128xf32> to vector<8xf32>
    %14 = vector.shape_cast %13 : vector<8xf32> to vector<8x1xf32>
    %cst_11 = arith.constant 1.270000e+02 : f32
    %15 = vector.broadcast %cst_11 : f32 to vector<8x1xf32>
    %16 = arith.divf %14, %15 : vector<8x1xf32>
    %17 = math.sqrt %16 : vector<8x1xf32>
    %18 = vector.broadcast %4 : vector<1x128xf32> to vector<8x128xf32>
    %19 = arith.mulf %18, %11 : vector<8x128xf32>
    %cst_12 = arith.constant 9.99999997E-7 : f32
    %20 = vector.broadcast %cst_12 : f32 to vector<8x1xf32>
    %21 = arith.addf %17, %20 : vector<8x1xf32>
    %22 = vector.broadcast %21 : vector<8x1xf32> to vector<8x128xf32>
    %23 = arith.divf %19, %22 : vector<8x128xf32>
    %24 = vector.broadcast %5 : vector<1x128xf32> to vector<8x128xf32>
    %25 = arith.addf %23, %24 : vector<8x128xf32>
    %26 = arith.truncf %25 : vector<8x128xf32> to vector<8x128xbf16>
    %c0_13 = arith.constant 0 : index
    %c0_14 = arith.constant 0 : index
    %27 = vector.load %arg7[%c0_13, %c0_14] : memref<128x384xbf16, #tpu.memory_space<vmem>>, vector<128x384xbf16>
    %cst_15 = arith.constant dense<0.000000e+00> : vector<8x384xf32>
    %28 = tpu.matmul %26, %27, %cst_15 {dimension_numbers = #tpu.dot_dimension_numbers<[1], [0], [0], [1], [0, 0, 1, 1], [], []>} : vector<8x128xbf16>, vector<128x384xbf16>, vector<8x384xf32> -> vector<8x384xf32>
    %c0_16 = arith.constant 0 : index
    %c0_17 = arith.constant 0 : index
    %29 = vector.load %arg8[%c0_16, %c0_17] : memref<1x384xf32, #tpu.memory_space<vmem>>, vector<1x384xf32>
    %30 = vector.broadcast %29 : vector<1x384xf32> to vector<8x384xf32>
    %31 = arith.addf %28, %30 : vector<8x384xf32>
    %32 = vector.extract_strided_slice %31 {offsets = [0, 0], sizes = [8, 128], strides = [1, 1]} : vector<8x384xf32> to vector<8x128xf32>
    %33 = vector.extract_strided_slice %31 {offsets = [0, 128], sizes = [8, 128], strides = [1, 1]} : vector<8x384xf32> to vector<8x128xf32>
    %34 = vector.extract_strided_slice %31 {offsets = [0, 256], sizes = [8, 128], strides = [1, 1]} : vector<8x384xf32> to vector<8x128xf32>
    %c0_18 = arith.constant 0 : index
    %c0_19 = arith.constant 0 : index
    %c0_20 = arith.constant 0 : index
    %35 = vector.load %arg3[%c0_18, %c0_19, %c0_20] : memref<1x8x8xf32, #tpu.memory_space<vmem>>, vector<1x8x8xf32>
    %36 = vector.shape_cast %35 : vector<1x8x8xf32> to vector<8x8xf32>
    %37 = arith.truncf %32 : vector<8x128xf32> to vector<8x128xbf16>
    %38 = arith.truncf %33 : vector<8x128xf32> to vector<8x128xbf16>
    %39 = arith.truncf %34 : vector<8x128xf32> to vector<8x128xbf16>
    %40 = vector.extract_strided_slice %37 {offsets = [0, 0], sizes = [8, 32], strides = [1, 1]} : vector<8x128xbf16> to vector<8x32xbf16>
    %41 = vector.extract_strided_slice %38 {offsets = [0, 0], sizes = [8, 32], strides = [1, 1]} : vector<8x128xbf16> to vector<8x32xbf16>
    %cst_21 = arith.constant dense<0.000000e+00> : vector<8x8xf32>
    %42 = tpu.matmul %40, %41, %cst_21 {dimension_numbers = #tpu.dot_dimension_numbers<[1], [1], [0], [0], [0, 0, 1, 0], [], []>} : vector<8x32xbf16>, vector<8x32xbf16>, vector<8x8xf32> -> vector<8x8xf32>
    %43 = arith.addf %42, %36 : vector<8x8xf32>
    %cst_22 = arith.constant dense<0xFF800000> : vector<8xf32>
    %44 = vector.multi_reduction <maximumf>, %43, %cst_22 [1] : vector<8x8xf32> to vector<8xf32>
    %45 = vector.shape_cast %44 : vector<8xf32> to vector<8x1xf32>
    %46 = vector.broadcast %45 : vector<8x1xf32> to vector<8x8xf32>
    %47 = arith.subf %43, %46 : vector<8x8xf32>
    %48 = math.exp %47 : vector<8x8xf32>
    %cst_23 = arith.constant dense<0.000000e+00> : vector<8xf32>
    %49 = vector.multi_reduction <add>, %48, %cst_23 [1] : vector<8x8xf32> to vector<8xf32>
    %50 = vector.shape_cast %49 : vector<8xf32> to vector<8x1xf32>
    %51 = tpu.reciprocal %50 {approx = true} : vector<8x1xf32> -> vector<8x1xf32>
    %52 = vector.broadcast %51 : vector<8x1xf32> to vector<8x8xf32>
    %53 = arith.mulf %48, %52 : vector<8x8xf32>
    %54 = arith.truncf %53 : vector<8x8xf32> to vector<8x8xbf16>
    %55 = vector.extract_strided_slice %39 {offsets = [0, 0], sizes = [8, 32], strides = [1, 1]} : vector<8x128xbf16> to vector<8x32xbf16>
    %cst_24 = arith.constant dense<0.000000e+00> : vector<8x32xf32>
    %56 = tpu.matmul %54, %55, %cst_24 {dimension_numbers = #tpu.dot_dimension_numbers<[1], [0], [0], [1], [0, 0, 1, 1], [], []>} : vector<8x8xbf16>, vector<8x32xbf16>, vector<8x32xf32> -> vector<8x32xf32>
    %c0_25 = arith.constant 0 : index
    %c0_26 = arith.constant 0 : index
    %57 = vector.load %arg26[%c0_25, %c0_26] : memref<8x128xf32, #tpu.memory_space<vmem>>, vector<8x32xf32>
    tpu.vector_store %arg26[%c0_25, %c0_26], %56 {strides = array<i32>} : memref<8x128xf32, #tpu.memory_space<vmem>>, vector<8x32xf32>,
    %58 = vector.extract_strided_slice %37 {offsets = [0, 32], sizes = [8, 32], strides = [1, 1]} : vector<8x128xbf16> to vector<8x32xbf16>
    %59 = vector.extract_strided_slice %38 {offsets = [0, 32], sizes = [8, 32], strides = [1, 1]} : vector<8x128xbf16> to vector<8x32xbf16>
    %cst_27 = arith.constant dense<0.000000e+00> : vector<8x8xf32>
    %60 = tpu.matmul %58, %59, %cst_27 {dimension_numbers = #tpu.dot_dimension_numbers<[1], [1], [0], [0], [0, 0, 1, 0], [], []>} : vector<8x32xbf16>, vector<8x32xbf16>, vector<8x8xf32> -> vector<8x8xf32>
    %61 = arith.addf %60, %36 : vector<8x8xf32>
    %cst_28 = arith.constant dense<0xFF800000> : vector<8xf32>
    %62 = vector.multi_reduction <maximumf>, %61, %cst_28 [1] : vector<8x8xf32> to vector<8xf32>
    %63 = vector.shape_cast %62 : vector<8xf32> to vector<8x1xf32>
    %64 = vector.broadcast %63 : vector<8x1xf32> to vector<8x8xf32>
    %65 = arith.subf %61, %64 : vector<8x8xf32>
    %66 = math.exp %65 : vector<8x8xf32>
    %cst_29 = arith.constant dense<0.000000e+00> : vector<8xf32>
    %67 = vector.multi_reduction <add>, %66, %cst_29 [1] : vector<8x8xf32> to vector<8xf32>
    %68 = vector.shape_cast %67 : vector<8xf32> to vector<8x1xf32>
    %69 = tpu.reciprocal %68 {approx = true} : vector<8x1xf32> -> vector<8x1xf32>
    %70 = vector.broadcast %69 : vector<8x1xf32> to vector<8x8xf32>
    %71 = arith.mulf %66, %70 : vector<8x8xf32>
    %72 = arith.truncf %71 : vector<8x8xf32> to vector<8x8xbf16>
    %73 = vector.extract_strided_slice %39 {offsets = [0, 32], sizes = [8, 32], strides = [1, 1]} : vector<8x128xbf16> to vector<8x32xbf16>
    %cst_30 = arith.constant dense<0.000000e+00> : vector<8x32xf32>
    %74 = tpu.matmul %72, %73, %cst_30 {dimension_numbers = #tpu.dot_dimension_numbers<[1], [0], [0], [1], [0, 0, 1, 1], [], []>} : vector<8x8xbf16>, vector<8x32xbf16>, vector<8x32xf32> -> vector<8x32xf32>
    %c0_31 = arith.constant 0 : index
    %c32 = arith.constant 32 : index
    %75 = vector.load %arg26[%c0_31, %c32] : memref<8x128xf32, #tpu.memory_space<vmem>>, vector<8x32xf32>
    tpu.vector_store %arg26[%c0_31, %c32], %74 {strides = array<i32>} : memref<8x128xf32, #tpu.memory_space<vmem>>, vector<8x32xf32>,
    %76 = vector.extract_strided_slice %37 {offsets = [0, 64], sizes = [8, 32], strides = [1, 1]} : vector<8x128xbf16> to vector<8x32xbf16>
    %77 = vector.extract_strided_slice %38 {offsets = [0, 64], sizes = [8, 32], strides = [1, 1]} : vector<8x128xbf16> to vector<8x32xbf16>
    %cst_32 = arith.constant dense<0.000000e+00> : vector<8x8xf32>
    %78 = tpu.matmul %76, %77, %cst_32 {dimension_numbers = #tpu.dot_dimension_numbers<[1], [1], [0], [0], [0, 0, 1, 0], [], []>} : vector<8x32xbf16>, vector<8x32xbf16>, vector<8x8xf32> -> vector<8x8xf32>
    %79 = arith.addf %78, %36 : vector<8x8xf32>
    %cst_33 = arith.constant dense<0xFF800000> : vector<8xf32>
    %80 = vector.multi_reduction <maximumf>, %79, %cst_33 [1] : vector<8x8xf32> to vector<8xf32>
    %81 = vector.shape_cast %80 : vector<8xf32> to vector<8x1xf32>
    %82 = vector.broadcast %81 : vector<8x1xf32> to vector<8x8xf32>
    %83 = arith.subf %79, %82 : vector<8x8xf32>
    %84 = math.exp %83 : vector<8x8xf32>
    %cst_34 = arith.constant dense<0.000000e+00> : vector<8xf32>
    %85 = vector.multi_reduction <add>, %84, %cst_34 [1] : vector<8x8xf32> to vector<8xf32>
    %86 = vector.shape_cast %85 : vector<8xf32> to vector<8x1xf32>
    %87 = tpu.reciprocal %86 {approx = true} : vector<8x1xf32> -> vector<8x1xf32>
    %88 = vector.broadcast %87 : vector<8x1xf32> to vector<8x8xf32>
    %89 = arith.mulf %84, %88 : vector<8x8xf32>
    %90 = arith.truncf %89 : vector<8x8xf32> to vector<8x8xbf16>
    %91 = vector.extract_strided_slice %39 {offsets = [0, 64], sizes = [8, 32], strides = [1, 1]} : vector<8x128xbf16> to vector<8x32xbf16>
    %cst_35 = arith.constant dense<0.000000e+00> : vector<8x32xf32>
    %92 = tpu.matmul %90, %91, %cst_35 {dimension_numbers = #tpu.dot_dimension_numbers<[1], [0], [0], [1], [0, 0, 1, 1], [], []>} : vector<8x8xbf16>, vector<8x32xbf16>, vector<8x32xf32> -> vector<8x32xf32>
    %c0_36 = arith.constant 0 : index
    %c64 = arith.constant 64 : index
    %93 = vector.load %arg26[%c0_36, %c64] : memref<8x128xf32, #tpu.memory_space<vmem>>, vector<8x32xf32>
    tpu.vector_store %arg26[%c0_36, %c64], %92 {strides = array<i32>} : memref<8x128xf32, #tpu.memory_space<vmem>>, vector<8x32xf32>,
    %94 = vector.extract_strided_slice %37 {offsets = [0, 96], sizes = [8, 32], strides = [1, 1]} : vector<8x128xbf16> to vector<8x32xbf16>
    %95 = vector.extract_strided_slice %38 {offsets = [0, 96], sizes = [8, 32], strides = [1, 1]} : vector<8x128xbf16> to vector<8x32xbf16>
    %cst_37 = arith.constant dense<0.000000e+00> : vector<8x8xf32>
    %96 = tpu.matmul %94, %95, %cst_37 {dimension_numbers = #tpu.dot_dimension_numbers<[1], [1], [0], [0], [0, 0, 1, 0], [], []>} : vector<8x32xbf16>, vector<8x32xbf16>, vector<8x8xf32> -> vector<8x8xf32>
    %97 = arith.addf %96, %36 : vector<8x8xf32>
    %cst_38 = arith.constant dense<0xFF800000> : vector<8xf32>
    %98 = vector.multi_reduction <maximumf>, %97, %cst_38 [1] : vector<8x8xf32> to vector<8xf32>
    %99 = vector.shape_cast %98 : vector<8xf32> to vector<8x1xf32>
    %100 = vector.broadcast %99 : vector<8x1xf32> to vector<8x8xf32>
    %101 = arith.subf %97, %100 : vector<8x8xf32>
    %102 = math.exp %101 : vector<8x8xf32>
    %cst_39 = arith.constant dense<0.000000e+00> : vector<8xf32>
    %103 = vector.multi_reduction <add>, %102, %cst_39 [1] : vector<8x8xf32> to vector<8xf32>
    %104 = vector.shape_cast %103 : vector<8xf32> to vector<8x1xf32>
    %105 = tpu.reciprocal %104 {approx = true} : vector<8x1xf32> -> vector<8x1xf32>
    %106 = vector.broadcast %105 : vector<8x1xf32> to vector<8x8xf32>
    %107 = arith.mulf %102, %106 : vector<8x8xf32>
    %108 = arith.truncf %107 : vector<8x8xf32> to vector<8x8xbf16>
    %109 = vector.extract_strided_slice %39 {offsets = [0, 96], sizes = [8, 32], strides = [1, 1]} : vector<8x128xbf16> to vector<8x32xbf16>
    %cst_40 = arith.constant dense<0.000000e+00> : vector<8x32xf32>
    %110 = tpu.matmul %108, %109, %cst_40 {dimension_numbers = #tpu.dot_dimension_numbers<[1], [0], [0], [1], [0, 0, 1, 1], [], []>} : vector<8x8xbf16>, vector<8x32xbf16>, vector<8x32xf32> -> vector<8x32xf32>
    %c0_41 = arith.constant 0 : index
    %c96 = arith.constant 96 : index
    %111 = vector.load %arg26[%c0_41, %c96] : memref<8x128xf32, #tpu.memory_space<vmem>>, vector<8x32xf32>
    tpu.vector_store %arg26[%c0_41, %c96], %110 {strides = array<i32>} : memref<8x128xf32, #tpu.memory_space<vmem>>, vector<8x32xf32>,
    %c0_42 = arith.constant 0 : index
    %c0_43 = arith.constant 0 : index
    %112 = vector.load %arg26[%c0_42, %c0_43] : memref<8x128xf32, #tpu.memory_space<vmem>>, vector<8x128xf32>
    %113 = arith.truncf %112 : vector<8x128xf32> to vector<8x128xbf16>
    %c0_44 = arith.constant 0 : index
    %c0_45 = arith.constant 0 : index
    %114 = vector.load %arg9[%c0_44, %c0_45] : memref<128x128xbf16, #tpu.memory_space<vmem>>, vector<128x128xbf16>
    %cst_46 = arith.constant dense<0.000000e+00> : vector<8x128xf32>
    %115 = tpu.matmul %113, %114, %cst_46 {dimension_numbers = #tpu.dot_dimension_numbers<[1], [0], [0], [1], [0, 0, 1, 1], [], []>} : vector<8x128xbf16>, vector<128x128xbf16>, vector<8x128xf32> -> vector<8x128xf32>
    %c0_47 = arith.constant 0 : index
    %c0_48 = arith.constant 0 : index
    %116 = vector.load %arg10[%c0_47, %c0_48] : memref<1x128xf32, #tpu.memory_space<vmem>>, vector<1x128xf32>
    %117 = vector.broadcast %116 : vector<1x128xf32> to vector<8x128xf32>
    %118 = arith.addf %115, %117 : vector<8x128xf32>
    %119 = arith.addf %1, %118 : vector<8x128xf32>
    %c0_49 = arith.constant 0 : index
    %c0_50 = arith.constant 0 : index
    %120 = vector.load %arg11[%c0_49, %c0_50] : memref<1x128xf32, #tpu.memory_space<vmem>>, vector<1x128xf32>
    %c0_51 = arith.constant 0 : index
    %c0_52 = arith.constant 0 : index
    %121 = vector.load %arg12[%c0_51, %c0_52] : memref<1x128xf32, #tpu.memory_space<vmem>>, vector<1x128xf32>
    %cst_53 = arith.constant dense<0.000000e+00> : vector<8xf32>
    %122 = vector.multi_reduction <add>, %119, %cst_53 [1] : vector<8x128xf32> to vector<8xf32>
    %123 = vector.shape_cast %122 : vector<8xf32> to vector<8x1xf32>
    %cst_54 = arith.constant 1.280000e+02 : f32
    %124 = vector.broadcast %cst_54 : f32 to vector<8x1xf32>
    %125 = arith.divf %123, %124 : vector<8x1xf32>
    %126 = vector.broadcast %125 : vector<8x1xf32> to vector<8x128xf32>
    %127 = arith.subf %119, %126 : vector<8x128xf32>
    %128 = arith.mulf %127, %127 : vector<8x128xf32>
    %cst_55 = arith.constant dense<0.000000e+00> : vector<8xf32>
    %129 = vector.multi_reduction <add>, %128, %cst_55 [1] : vector<8x128xf32> to vector<8xf32>
    %130 = vector.shape_cast %129 : vector<8xf32> to vector<8x1xf32>
    %cst_56 = arith.constant 1.270000e+02 : f32
    %131 = vector.broadcast %cst_56 : f32 to vector<8x1xf32>
    %132 = arith.divf %130, %131 : vector<8x1xf32>
    %133 = math.sqrt %132 : vector<8x1xf32>
    %134 = vector.broadcast %120 : vector<1x128xf32> to vector<8x128xf32>
    %135 = arith.mulf %134, %127 : vector<8x128xf32>
    %cst_57 = arith.constant 9.99999997E-7 : f32
    %136 = vector.broadcast %cst_57 : f32 to vector<8x1xf32>
    %137 = arith.addf %133, %136 : vector<8x1xf32>
    %138 = vector.broadcast %137 : vector<8x1xf32> to vector<8x128xf32>
    %139 = arith.divf %135, %138 : vector<8x128xf32>
    %140 = vector.broadcast %121 : vector<1x128xf32> to vector<8x128xf32>
    %141 = arith.addf %139, %140 : vector<8x128xf32>
    %142 = arith.truncf %141 : vector<8x128xf32> to vector<8x128xbf16>
    %c0_58 = arith.constant 0 : index
    %c0_59 = arith.constant 0 : index
    %143 = vector.load %arg13[%c0_58, %c0_59] : memref<128x128xbf16, #tpu.memory_space<vmem>>, vector<128x128xbf16>
    %cst_60 = arith.constant dense<0.000000e+00> : vector<8x128xf32>
    %144 = tpu.matmul %142, %143, %cst_60 {dimension_numbers = #tpu.dot_dimension_numbers<[1], [0], [0], [1], [0, 0, 1, 1], [], []>} : vector<8x128xbf16>, vector<128x128xbf16>, vector<8x128xf32> -> vector<8x128xf32>
    %c0_61 = arith.constant 0 : index
    %c0_62 = arith.constant 0 : index
    %145 = vector.load %arg14[%c0_61, %c0_62] : memref<1x128xf32, #tpu.memory_space<vmem>>, vector<1x128xf32>
    %146 = vector.broadcast %145 : vector<1x128xf32> to vector<8x128xf32>
    %147 = arith.addf %144, %146 : vector<8x128xf32>
    %148 = arith.truncf %3 : vector<8x128xf32> to vector<8x128xbf16>
    %c0_63 = arith.constant 0 : index
    %c0_64 = arith.constant 0 : index
    %149 = vector.load %arg15[%c0_63, %c0_64] : memref<128x256xbf16, #tpu.memory_space<vmem>>, vector<128x256xbf16>
    %cst_65 = arith.constant dense<0.000000e+00> : vector<8x256xf32>
    %150 = tpu.matmul %148, %149, %cst_65 {dimension_numbers = #tpu.dot_dimension_numbers<[1], [0], [0], [1], [0, 0, 1, 1], [], []>} : vector<8x128xbf16>, vector<128x256xbf16>, vector<8x256xf32> -> vector<8x256xf32>
    %c0_66 = arith.constant 0 : index
    %c0_67 = arith.constant 0 : index
    %151 = vector.load %arg16[%c0_66, %c0_67] : memref<1x256xf32, #tpu.memory_space<vmem>>, vector<1x256xf32>
    %152 = vector.broadcast %151 : vector<1x256xf32> to vector<8x256xf32>
    %153 = arith.addf %150, %152 : vector<8x256xf32>
    %154 = vector.extract_strided_slice %153 {offsets = [0, 0], sizes = [8, 128], strides = [1, 1]} : vector<8x256xf32> to vector<8x128xf32>
    %155 = vector.extract_strided_slice %153 {offsets = [0, 128], sizes = [8, 128], strides = [1, 1]} : vector<8x256xf32> to vector<8x128xf32>
    %c0_68 = arith.constant 0 : index
    %c0_69 = arith.constant 0 : index
    %c0_70 = arith.constant 0 : index
    %156 = vector.load %arg4[%c0_68, %c0_69, %c0_70] : memref<1x1x8xf32, #tpu.memory_space<vmem>>, vector<1x1x8xf32>
    %157 = vector.shape_cast %156 : vector<1x1x8xf32> to vector<1x8xf32>
    %158 = arith.truncf %147 : vector<8x128xf32> to vector<8x128xbf16>
    %159 = arith.truncf %154 : vector<8x128xf32> to vector<8x128xbf16>
    %160 = arith.truncf %155 : vector<8x128xf32> to vector<8x128xbf16>
    %161 = vector.extract_strided_slice %158 {offsets = [0, 0], sizes = [8, 32], strides = [1, 1]} : vector<8x128xbf16> to vector<8x32xbf16>
    %162 = vector.extract_strided_slice %159 {offsets = [0, 0], sizes = [8, 32], strides = [1, 1]} : vector<8x128xbf16> to vector<8x32xbf16>
    %cst_71 = arith.constant dense<0.000000e+00> : vector<8x8xf32>
    %163 = tpu.matmul %161, %162, %cst_71 {dimension_numbers = #tpu.dot_dimension_numbers<[1], [1], [0], [0], [0, 0, 1, 0], [], []>} : vector<8x32xbf16>, vector<8x32xbf16>, vector<8x8xf32> -> vector<8x8xf32>
    %164 = vector.broadcast %157 : vector<1x8xf32> to vector<8x8xf32>
    %165 = arith.addf %163, %164 : vector<8x8xf32>
    %cst_72 = arith.constant dense<0xFF800000> : vector<8xf32>
    %166 = vector.multi_reduction <maximumf>, %165, %cst_72 [1] : vector<8x8xf32> to vector<8xf32>
    %167 = vector.shape_cast %166 : vector<8xf32> to vector<8x1xf32>
    %168 = vector.broadcast %167 : vector<8x1xf32> to vector<8x8xf32>
    %169 = arith.subf %165, %168 : vector<8x8xf32>
    %170 = math.exp %169 : vector<8x8xf32>
    %cst_73 = arith.constant dense<0.000000e+00> : vector<8xf32>
    %171 = vector.multi_reduction <add>, %170, %cst_73 [1] : vector<8x8xf32> to vector<8xf32>
    %172 = vector.shape_cast %171 : vector<8xf32> to vector<8x1xf32>
    %173 = tpu.reciprocal %172 {approx = true} : vector<8x1xf32> -> vector<8x1xf32>
    %174 = vector.broadcast %173 : vector<8x1xf32> to vector<8x8xf32>
    %175 = arith.mulf %170, %174 : vector<8x8xf32>
    %176 = arith.truncf %175 : vector<8x8xf32> to vector<8x8xbf16>
    %177 = vector.extract_strided_slice %160 {offsets = [0, 0], sizes = [8, 32], strides = [1, 1]} : vector<8x128xbf16> to vector<8x32xbf16>
    %cst_74 = arith.constant dense<0.000000e+00> : vector<8x32xf32>
    %178 = tpu.matmul %176, %177, %cst_74 {dimension_numbers = #tpu.dot_dimension_numbers<[1], [0], [0], [1], [0, 0, 1, 1], [], []>} : vector<8x8xbf16>, vector<8x32xbf16>, vector<8x32xf32> -> vector<8x32xf32>
    %c0_75 = arith.constant 0 : index
    %c0_76 = arith.constant 0 : index
    %179 = vector.load %arg26[%c0_75, %c0_76] : memref<8x128xf32, #tpu.memory_space<vmem>>, vector<8x32xf32>
    tpu.vector_store %arg26[%c0_75, %c0_76], %178 {strides = array<i32>} : memref<8x128xf32, #tpu.memory_space<vmem>>, vector<8x32xf32>,
    %180 = vector.extract_strided_slice %158 {offsets = [0, 32], sizes = [8, 32], strides = [1, 1]} : vector<8x128xbf16> to vector<8x32xbf16>
    %181 = vector.extract_strided_slice %159 {offsets = [0, 32], sizes = [8, 32], strides = [1, 1]} : vector<8x128xbf16> to vector<8x32xbf16>
    %cst_77 = arith.constant dense<0.000000e+00> : vector<8x8xf32>
    %182 = tpu.matmul %180, %181, %cst_77 {dimension_numbers = #tpu.dot_dimension_numbers<[1], [1], [0], [0], [0, 0, 1, 0], [], []>} : vector<8x32xbf16>, vector<8x32xbf16>, vector<8x8xf32> -> vector<8x8xf32>
    %183 = vector.broadcast %157 : vector<1x8xf32> to vector<8x8xf32>
    %184 = arith.addf %182, %183 : vector<8x8xf32>
    %cst_78 = arith.constant dense<0xFF800000> : vector<8xf32>
    %185 = vector.multi_reduction <maximumf>, %184, %cst_78 [1] : vector<8x8xf32> to vector<8xf32>
    %186 = vector.shape_cast %185 : vector<8xf32> to vector<8x1xf32>
    %187 = vector.broadcast %186 : vector<8x1xf32> to vector<8x8xf32>
    %188 = arith.subf %184, %187 : vector<8x8xf32>
    %189 = math.exp %188 : vector<8x8xf32>
    %cst_79 = arith.constant dense<0.000000e+00> : vector<8xf32>
    %190 = vector.multi_reduction <add>, %189, %cst_79 [1] : vector<8x8xf32> to vector<8xf32>
    %191 = vector.shape_cast %190 : vector<8xf32> to vector<8x1xf32>
    %192 = tpu.reciprocal %191 {approx = true} : vector<8x1xf32> -> vector<8x1xf32>
    %193 = vector.broadcast %192 : vector<8x1xf32> to vector<8x8xf32>
    %194 = arith.mulf %189, %193 : vector<8x8xf32>
    %195 = arith.truncf %194 : vector<8x8xf32> to vector<8x8xbf16>
    %196 = vector.extract_strided_slice %160 {offsets = [0, 32], sizes = [8, 32], strides = [1, 1]} : vector<8x128xbf16> to vector<8x32xbf16>
    %cst_80 = arith.constant dense<0.000000e+00> : vector<8x32xf32>
    %197 = tpu.matmul %195, %196, %cst_80 {dimension_numbers = #tpu.dot_dimension_numbers<[1], [0], [0], [1], [0, 0, 1, 1], [], []>} : vector<8x8xbf16>, vector<8x32xbf16>, vector<8x32xf32> -> vector<8x32xf32>
    %c0_81 = arith.constant 0 : index
    %c32_82 = arith.constant 32 : index
    %198 = vector.load %arg26[%c0_81, %c32_82] : memref<8x128xf32, #tpu.memory_space<vmem>>, vector<8x32xf32>
    tpu.vector_store %arg26[%c0_81, %c32_82], %197 {strides = array<i32>} : memref<8x128xf32, #tpu.memory_space<vmem>>, vector<8x32xf32>,
    %199 = vector.extract_strided_slice %158 {offsets = [0, 64], sizes = [8, 32], strides = [1, 1]} : vector<8x128xbf16> to vector<8x32xbf16>
    %200 = vector.extract_strided_slice %159 {offsets = [0, 64], sizes = [8, 32], strides = [1, 1]} : vector<8x128xbf16> to vector<8x32xbf16>
    %cst_83 = arith.constant dense<0.000000e+00> : vector<8x8xf32>
    %201 = tpu.matmul %199, %200, %cst_83 {dimension_numbers = #tpu.dot_dimension_numbers<[1], [1], [0], [0], [0, 0, 1, 0], [], []>} : vector<8x32xbf16>, vector<8x32xbf16>, vector<8x8xf32> -> vector<8x8xf32>
    %202 = vector.broadcast %157 : vector<1x8xf32> to vector<8x8xf32>
    %203 = arith.addf %201, %202 : vector<8x8xf32>
    %cst_84 = arith.constant dense<0xFF800000> : vector<8xf32>
    %204 = vector.multi_reduction <maximumf>, %203, %cst_84 [1] : vector<8x8xf32> to vector<8xf32>
    %205 = vector.shape_cast %204 : vector<8xf32> to vector<8x1xf32>
    %206 = vector.broadcast %205 : vector<8x1xf32> to vector<8x8xf32>
    %207 = arith.subf %203, %206 : vector<8x8xf32>
    %208 = math.exp %207 : vector<8x8xf32>
    %cst_85 = arith.constant dense<0.000000e+00> : vector<8xf32>
    %209 = vector.multi_reduction <add>, %208, %cst_85 [1] : vector<8x8xf32> to vector<8xf32>
    %210 = vector.shape_cast %209 : vector<8xf32> to vector<8x1xf32>
    %211 = tpu.reciprocal %210 {approx = true} : vector<8x1xf32> -> vector<8x1xf32>
    %212 = vector.broadcast %211 : vector<8x1xf32> to vector<8x8xf32>
    %213 = arith.mulf %208, %212 : vector<8x8xf32>
    %214 = arith.truncf %213 : vector<8x8xf32> to vector<8x8xbf16>
    %215 = vector.extract_strided_slice %160 {offsets = [0, 64], sizes = [8, 32], strides = [1, 1]} : vector<8x128xbf16> to vector<8x32xbf16>
    %cst_86 = arith.constant dense<0.000000e+00> : vector<8x32xf32>
    %216 = tpu.matmul %214, %215, %cst_86 {dimension_numbers = #tpu.dot_dimension_numbers<[1], [0], [0], [1], [0, 0, 1, 1], [], []>} : vector<8x8xbf16>, vector<8x32xbf16>, vector<8x32xf32> -> vector<8x32xf32>
    %c0_87 = arith.constant 0 : index
    %c64_88 = arith.constant 64 : index
    %217 = vector.load %arg26[%c0_87, %c64_88] : memref<8x128xf32, #tpu.memory_space<vmem>>, vector<8x32xf32>
    tpu.vector_store %arg26[%c0_87, %c64_88], %216 {strides = array<i32>} : memref<8x128xf32, #tpu.memory_space<vmem>>, vector<8x32xf32>,
    %218 = vector.extract_strided_slice %158 {offsets = [0, 96], sizes = [8, 32], strides = [1, 1]} : vector<8x128xbf16> to vector<8x32xbf16>
    %219 = vector.extract_strided_slice %159 {offsets = [0, 96], sizes = [8, 32], strides = [1, 1]} : vector<8x128xbf16> to vector<8x32xbf16>
    %cst_89 = arith.constant dense<0.000000e+00> : vector<8x8xf32>
    %220 = tpu.matmul %218, %219, %cst_89 {dimension_numbers = #tpu.dot_dimension_numbers<[1], [1], [0], [0], [0, 0, 1, 0], [], []>} : vector<8x32xbf16>, vector<8x32xbf16>, vector<8x8xf32> -> vector<8x8xf32>
    %221 = vector.broadcast %157 : vector<1x8xf32> to vector<8x8xf32>
    %222 = arith.addf %220, %221 : vector<8x8xf32>
    %cst_90 = arith.constant dense<0xFF800000> : vector<8xf32>
    %223 = vector.multi_reduction <maximumf>, %222, %cst_90 [1] : vector<8x8xf32> to vector<8xf32>
    %224 = vector.shape_cast %223 : vector<8xf32> to vector<8x1xf32>
    %225 = vector.broadcast %224 : vector<8x1xf32> to vector<8x8xf32>
    %226 = arith.subf %222, %225 : vector<8x8xf32>
    %227 = math.exp %226 : vector<8x8xf32>
    %cst_91 = arith.constant dense<0.000000e+00> : vector<8xf32>
    %228 = vector.multi_reduction <add>, %227, %cst_91 [1] : vector<8x8xf32> to vector<8xf32>
    %229 = vector.shape_cast %228 : vector<8xf32> to vector<8x1xf32>
    %230 = tpu.reciprocal %229 {approx = true} : vector<8x1xf32> -> vector<8x1xf32>
    %231 = vector.broadcast %230 : vector<8x1xf32> to vector<8x8xf32>
    %232 = arith.mulf %227, %231 : vector<8x8xf32>
    %233 = arith.truncf %232 : vector<8x8xf32> to vector<8x8xbf16>
    %234 = vector.extract_strided_slice %160 {offsets = [0, 96], sizes = [8, 32], strides = [1, 1]} : vector<8x128xbf16> to vector<8x32xbf16>
    %cst_92 = arith.constant dense<0.000000e+00> : vector<8x32xf32>
    %235 = tpu.matmul %233, %234, %cst_92 {dimension_numbers = #tpu.dot_dimension_numbers<[1], [0], [0], [1], [0, 0, 1, 1], [], []>} : vector<8x8xbf16>, vector<8x32xbf16>, vector<8x32xf32> -> vector<8x32xf32>
    %c0_93 = arith.constant 0 : index
    %c96_94 = arith.constant 96 : index
    %236 = vector.load %arg26[%c0_93, %c96_94] : memref<8x128xf32, #tpu.memory_space<vmem>>, vector<8x32xf32>
    tpu.vector_store %arg26[%c0_93, %c96_94], %235 {strides = array<i32>} : memref<8x128xf32, #tpu.memory_space<vmem>>, vector<8x32xf32>,
    %c0_95 = arith.constant 0 : index
    %c0_96 = arith.constant 0 : index
    %237 = vector.load %arg26[%c0_95, %c0_96] : memref<8x128xf32, #tpu.memory_space<vmem>>, vector<8x128xf32>
    %238 = arith.truncf %237 : vector<8x128xf32> to vector<8x128xbf16>
    %c0_97 = arith.constant 0 : index
    %c0_98 = arith.constant 0 : index
    %239 = vector.load %arg17[%c0_97, %c0_98] : memref<128x128xbf16, #tpu.memory_space<vmem>>, vector<128x128xbf16>
    %cst_99 = arith.constant dense<0.000000e+00> : vector<8x128xf32>
    %240 = tpu.matmul %238, %239, %cst_99 {dimension_numbers = #tpu.dot_dimension_numbers<[1], [0], [0], [1], [0, 0, 1, 1], [], []>} : vector<8x128xbf16>, vector<128x128xbf16>, vector<8x128xf32> -> vector<8x128xf32>
    %c0_100 = arith.constant 0 : index
    %c0_101 = arith.constant 0 : index
    %241 = vector.load %arg18[%c0_100, %c0_101] : memref<1x128xf32, #tpu.memory_space<vmem>>, vector<1x128xf32>
    %242 = vector.broadcast %241 : vector<1x128xf32> to vector<8x128xf32>
    %243 = arith.addf %240, %242 : vector<8x128xf32>
    %244 = arith.addf %119, %243 : vector<8x128xf32>
    %c0_102 = arith.constant 0 : index
    %c0_103 = arith.constant 0 : index
    %245 = vector.load %arg19[%c0_102, %c0_103] : memref<1x128xf32, #tpu.memory_space<vmem>>, vector<1x128xf32>
    %c0_104 = arith.constant 0 : index
    %c0_105 = arith.constant 0 : index
    %246 = vector.load %arg20[%c0_104, %c0_105] : memref<1x128xf32, #tpu.memory_space<vmem>>, vector<1x128xf32>
    %cst_106 = arith.constant dense<0.000000e+00> : vector<8xf32>
    %247 = vector.multi_reduction <add>, %244, %cst_106 [1] : vector<8x128xf32> to vector<8xf32>
    %248 = vector.shape_cast %247 : vector<8xf32> to vector<8x1xf32>
    %cst_107 = arith.constant 1.280000e+02 : f32
    %249 = vector.broadcast %cst_107 : f32 to vector<8x1xf32>
    %250 = arith.divf %248, %249 : vector<8x1xf32>
    %251 = vector.broadcast %250 : vector<8x1xf32> to vector<8x128xf32>
    %252 = arith.subf %244, %251 : vector<8x128xf32>
    %253 = arith.mulf %252, %252 : vector<8x128xf32>
    %cst_108 = arith.constant dense<0.000000e+00> : vector<8xf32>
    %254 = vector.multi_reduction <add>, %253, %cst_108 [1] : vector<8x128xf32> to vector<8xf32>
    %255 = vector.shape_cast %254 : vector<8xf32> to vector<8x1xf32>
    %cst_109 = arith.constant 1.270000e+02 : f32
    %256 = vector.broadcast %cst_109 : f32 to vector<8x1xf32>
    %257 = arith.divf %255, %256 : vector<8x1xf32>
    %258 = math.sqrt %257 : vector<8x1xf32>
    %259 = vector.broadcast %245 : vector<1x128xf32> to vector<8x128xf32>
    %260 = arith.mulf %259, %252 : vector<8x128xf32>
    %cst_110 = arith.constant 9.99999997E-7 : f32
    %261 = vector.broadcast %cst_110 : f32 to vector<8x1xf32>
    %262 = arith.addf %258, %261 : vector<8x1xf32>
    %263 = vector.broadcast %262 : vector<8x1xf32> to vector<8x128xf32>
    %264 = arith.divf %260, %263 : vector<8x128xf32>
    %265 = vector.broadcast %246 : vector<1x128xf32> to vector<8x128xf32>
    %266 = arith.addf %264, %265 : vector<8x128xf32>
    %267 = arith.truncf %266 : vector<8x128xf32> to vector<8x128xbf16>
    %c0_111 = arith.constant 0 : index
    %c0_112 = arith.constant 0 : index
    %268 = vector.load %arg21[%c0_111, %c0_112] : memref<128x256xbf16, #tpu.memory_space<vmem>>, vector<128x256xbf16>
    %cst_113 = arith.constant dense<0.000000e+00> : vector<8x256xf32>
    %269 = tpu.matmul %267, %268, %cst_113 {dimension_numbers = #tpu.dot_dimension_numbers<[1], [0], [0], [1], [0, 0, 1, 1], [], []>} : vector<8x128xbf16>, vector<128x256xbf16>, vector<8x256xf32> -> vector<8x256xf32>
    %c0_114 = arith.constant 0 : index
    %c0_115 = arith.constant 0 : index
    %270 = vector.load %arg22[%c0_114, %c0_115] : memref<1x256xf32, #tpu.memory_space<vmem>>, vector<1x256xf32>
    %271 = vector.broadcast %270 : vector<1x256xf32> to vector<8x256xf32>
    %272 = arith.addf %269, %271 : vector<8x256xf32>
    %cst_116 = arith.constant 0.000000e+00 : f32
    %273 = vector.broadcast %cst_116 : f32 to vector<8x256xf32>
    %274 = arith.maximumf %272, %273 : vector<8x256xf32>
    %275 = arith.truncf %274 : vector<8x256xf32> to vector<8x256xbf16>
    %c0_117 = arith.constant 0 : index
    %c0_118 = arith.constant 0 : index
    %276 = vector.load %arg23[%c0_117, %c0_118] : memref<256x128xbf16, #tpu.memory_space<vmem>>, vector<256x128xbf16>
    %cst_119 = arith.constant dense<0.000000e+00> : vector<8x128xf32>
    %277 = tpu.matmul %275, %276, %cst_119 {dimension_numbers = #tpu.dot_dimension_numbers<[1], [0], [0], [1], [0, 0, 1, 1], [], []>} : vector<8x256xbf16>, vector<256x128xbf16>, vector<8x128xf32> -> vector<8x128xf32>
    %c0_120 = arith.constant 0 : index
    %c0_121 = arith.constant 0 : index
    %278 = vector.load %arg24[%c0_120, %c0_121] : memref<1x128xf32, #tpu.memory_space<vmem>>, vector<1x128xf32>
    %279 = vector.broadcast %278 : vector<1x128xf32> to vector<8x128xf32>
    %280 = arith.addf %277, %279 : vector<8x128xf32>
    %281 = arith.addf %244, %280 : vector<8x128xf32>
    %c0_122 = arith.constant 0 : index
    %c0_123 = arith.constant 0 : index
    %c0_124 = arith.constant 0 : index
    %282 = vector.load %arg25[%c0_122, %c0_123, %c0_124] : memref<1x8x128xf32, #tpu.memory_space<vmem>>, vector<1x8x128xf32>
    %283 = vector.shape_cast %282 : vector<1x8x128xf32> to vector<8x128xf32>
    %284 = vector.shape_cast %281 : vector<8x128xf32> to vector<1x8x128xf32>
    tpu.vector_store %arg25[%c0_122, %c0_123, %c0_124], %284 {strides = array<i32>} : memref<1x8x128xf32, #tpu.memory_space<vmem>>, vector<1x8x128xf32>,
    return
  }
  func.func @transform_0(%arg0: i32) -> (i32, i32, i32) {
    %c0_i32 = arith.constant 0 : i32
    %c0_i32_0 = arith.constant 0 : i32
    %c0_i32_1 = arith.constant 0 : i32
    return %arg0, %c0_i32, %c0_i32_0 : i32, i32, i32
  }
  func.func @transform_1(%arg0: i32) -> (i32, i32, i32) {
    %c0_i32 = arith.constant 0 : i32
    %c0_i32_0 = arith.constant 0 : i32
    %c0_i32_1 = arith.constant 0 : i32
    return %arg0, %c0_i32, %c0_i32_0 : i32, i32, i32
  }
  func.func @transform_2(%arg0: i32) -> (i32, i32, i32) {
    %c0_i32 = arith.constant 0 : i32
    %c0_i32_0 = arith.constant 0 : i32
    %c0_i32_1 = arith.constant 0 : i32
    return %arg0, %c0_i32, %c0_i32_0 : i32, i32, i32
  }
  func.func @transform_3(%arg0: i32) -> (i32, i32, i32) {
    %c0_i32 = arith.constant 0 : i32
    %c0_i32_0 = arith.constant 0 : i32
    %c0_i32_1 = arith.constant 0 : i32
    return %arg0, %c0_i32, %c0_i32_0 : i32, i32, i32
  }
  func.func @transform_4(%arg0: i32) -> (i32, i32) {
    %c0_i32 = arith.constant 0 : i32
    %c0_i32_0 = arith.constant 0 : i32
    %c0_i32_1 = arith.constant 0 : i32
    return %c0_i32, %c0_i32_0 : i32, i32
  }
  func.func @transform_5(%arg0: i32) -> (i32, i32) {
    %c0_i32 = arith.constant 0 : i32
    %c0_i32_0 = arith.constant 0 : i32
    %c0_i32_1 = arith.constant 0 : i32
    return %c0_i32, %c0_i32_0 : i32, i32
  }
  func.func @transform_6(%arg0: i32) -> (i32, i32) {
    %c0_i32 = arith.constant 0 : i32
    %c0_i32_0 = arith.constant 0 : i32
    %c0_i32_1 = arith.constant 0 : i32
    return %c0_i32, %c0_i32_0 : i32, i32
  }
  func.func @transform_7(%arg0: i32) -> (i32, i32) {
    %c0_i32 = arith.constant 0 : i32
    %c0_i32_0 = arith.constant 0 : i32
    %c0_i32_1 = arith.constant 0 : i32
    return %c0_i32, %c0_i32_0 : i32, i32
  }
  func.func @transform_8(%arg0: i32) -> (i32, i32) {
    %c0_i32 = arith.constant 0 : i32
    %c0_i32_0 = arith.constant 0 : i32
    %c0_i32_1 = arith.constant 0 : i32
    return %c0_i32, %c0_i32_0 : i32, i32
  }
  func.func @transform_9(%arg0: i32) -> (i32, i32) {
    %c0_i32 = arith.constant 0 : i32
    %c0_i32_0 = arith.constant 0 : i32
    %c0_i32_1 = arith.constant 0 : i32
    return %c0_i32, %c0_i32_0 : i32, i32
  }
  func.func @transform_10(%arg0: i32) -> (i32, i32) {
    %c0_i32 = arith.constant 0 : i32
    %c0_i32_0 = arith.constant 0 : i32
    %c0_i32_1 = arith.constant 0 : i32
    return %c0_i32, %c0_i32_0 : i32, i32
  }
  func.func @transform_11(%arg0: i32) -> (i32, i32) {
    %c0_i32 = arith.constant 0 : i32
    %c0_i32_0 = arith.constant 0 : i32
    %c0_i32_1 = arith.constant 0 : i32
    return %c0_i32, %c0_i32_0 : i32, i32
  }
  func.func @transform_12(%arg0: i32) -> (i32, i32) {
    %c0_i32 = arith.constant 0 : i32
    %c0_i32_0 = arith.constant 0 : i32
    %c0_i32_1 = arith.constant 0 : i32
    return %c0_i32, %c0_i32_0 : i32, i32
  }
  func.func @transform_13(%arg0: i32) -> (i32, i32) {
    %c0_i32 = arith.constant 0 : i32
    %c0_i32_0 = arith.constant 0 : i32
    %c0_i32_1 = arith.constant 0 : i32
    return %c0_i32, %c0_i32_0 : i32, i32
  }
  func.func @transform_14(%arg0: i32) -> (i32, i32) {
    %c0_i32 = arith.constant 0 : i32
    %c0_i32_0 = arith.constant 0 : i32
    %c0_i32_1 = arith.constant 0 : i32
    return %c0_i32, %c0_i32_0 : i32, i32
  }
  func.func @transform_15(%arg0: i32) -> (i32, i32) {
    %c0_i32 = arith.constant 0 : i32
    %c0_i32_0 = arith.constant 0 : i32
    %c0_i32_1 = arith.constant 0 : i32
    return %c0_i32, %c0_i32_0 : i32, i32
  }
  func.func @transform_16(%arg0: i32) -> (i32, i32) {
    %c0_i32 = arith.constant 0 : i32
    %c0_i32_0 = arith.constant 0 : i32
    %c0_i32_1 = arith.constant 0 : i32
    return %c0_i32, %c0_i32_0 : i32, i32
  }
  func.func @transform_17(%arg0: i32) -> (i32, i32) {
    %c0_i32 = arith.constant 0 : i32
    %c0_i32_0 = arith.constant 0 : i32
    %c0_i32_1 = arith.constant 0 : i32
    return %c0_i32, %c0_i32_0 : i32, i32
  }
  func.func @transform_18(%arg0: i32) -> (i32, i32) {
    %c0_i32 = arith.constant 0 : i32
    %c0_i32_0 = arith.constant 0 : i32
    %c0_i32_1 = arith.constant 0 : i32
    return %c0_i32, %c0_i32_0 : i32, i32
  }
  func.func @transform_19(%arg0: i32) -> (i32, i32) {
    %c0_i32 = arith.constant 0 : i32
    %c0_i32_0 = arith.constant 0 : i32
    %c0_i32_1 = arith.constant 0 : i32
    return %c0_i32, %c0_i32_0 : i32, i32
  }
  func.func @transform_20(%arg0: i32) -> (i32, i32) {
    %c0_i32 = arith.constant 0 : i32
    %c0_i32_0 = arith.constant 0 : i32
    %c0_i32_1 = arith.constant 0 : i32
    return %c0_i32, %c0_i32_0 : i32, i32
  }
  func.func @transform_21(%arg0: i32) -> (i32, i32) {
    %c0_i32 = arith.constant 0 : i32
    %c0_i32_0 = arith.constant 0 : i32
    %c0_i32_1 = arith.constant 0 : i32
    return %c0_i32, %c0_i32_0 : i32, i32
  }
  func.func @transform_22(%arg0: i32) -> (i32, i32) {
    %c0_i32 = arith.constant 0 : i32
    %c0_i32_0 = arith.constant 0 : i32
    %c0_i32_1 = arith.constant 0 : i32
    return %c0_i32, %c0_i32_0 : i32, i32
  }
  func.func @transform_23(%arg0: i32) -> (i32, i32) {
    %c0_i32 = arith.constant 0 : i32
    %c0_i32_0 = arith.constant 0 : i32
    %c0_i32_1 = arith.constant 0 : i32
    return %c0_i32, %c0_i32_0 : i32, i32
  }
  func.func @transform_24(%arg0: i32) -> (i32, i32, i32) {
    %c0_i32 = arith.constant 0 : i32
    %c0_i32_0 = arith.constant 0 : i32
    %c0_i32_1 = arith.constant 0 : i32
    return %arg0, %c0_i32, %c0_i32_0 : i32, i32, i32
  }
}

</mosaic_0001>

<bundles_post_ra>
// kernel: decoder_layer.1
= control target key start
LH: loop header
LB: loop body
LE: loop exit
PB: predicated region body
PF: predicated region fallthrough
CT: control target
= control target key end

     0   :  { %s5144_s0 = inlined_call_operand.vmem [shape: f32[2,8,128], index: 0, kind: input, shape index: {}]   ;;  %s5145_s1 = inlined_call_operand.vmem [shape: f32[2,8,128], index: 1, kind: input, shape index: {}]   ;;  %s5146_s2 = inlined_call_operand.vmem [shape: f32[2,8,8], index: 2, kind: input, shape index: {}]   ;;  %s5147_s3 = inlined_call_operand.vmem [shape: f32[2,1,8], index: 3, kind: input, shape index: {}]   ;;  %s5148_s4 = inlined_call_operand.vmem [shape: f32[1,128], index: 4, kind: input, shape index: {}]   ;;  %s5149_s5 = inlined_call_operand.vmem [shape: f32[1,128], index: 5, kind: input, shape index: {}]   ;;  %s5150_s6 = inlined_call_operand.hbm [shape: bf16[128,384], index: 6, kind: input, shape index: {}]   ;;  %s5151_s7 = inlined_call_operand.vmem [shape: f32[1,384], index: 7, kind: input, shape index: {}]   ;;  %s5152_s8 = inlined_call_operand.vmem [shape: bf16[128,128], index: 8, kind: input, shape index: {}]   ;;  %s5153_s9 = inlined_call_operand.vmem [shape: f32[1,128], index: 9, kind: input, shape index: {}]   ;;  %s5154_s10 = inlined_call_operand.vmem [shape: f32[1,128], index: 10, kind: input, shape index: {}]   ;;  %s5155_s11 = inlined_call_operand.vmem [shape: f32[1,128], index: 11, kind: input, shape index: {}]   ;;  %s5156_s12 = inlined_call_operand.hbm [shape: bf16[128,128], index: 12, kind: input, shape index: {}]   ;;  %s5157_s13 = inlined_call_operand.vmem [shape: f32[1,128], index: 13, kind: input, shape index: {}]   ;;  %s5158_s14 = inlined_call_operand.hbm [shape: bf16[128,256], index: 14, kind: input, shape index: {}]   ;;  %s5159_s15 = inlined_call_operand.vmem [shape: f32[1,256], index: 15, kind: input, shape index: {}]   ;;  %s5160_s16 = inlined_call_operand.hbm [shape: bf16[128,128], index: 16, kind: input, shape index: {}]   ;;  %s5161_s17 = inlined_call_operand.hbm [shape: f32[1,128], index: 17, kind: input, shape index: {}]   ;;  %s5162_s18 = inlined_call_operand.hbm [shape: f32[1,128], index: 18, kind: input, shape index: {}]   ;;  %s5163_s19 = inlined_call_operand.hbm [shape: f32[1,128], index: 19, kind: input, shape index: {}]   ;;  %s5164_s20 = inlined_call_operand.hbm [shape: bf16[128,256], index: 20, kind: input, shape index: {}]   ;;  %s5165_s21 = inlined_call_operand.vmem [shape: f32[1,256], index: 21, kind: input, shape index: {}]   ;;  %s5166_s22 = inlined_call_operand.hbm [shape: bf16[256,128], index: 22, kind: input, shape index: {}]   ;;  %s5167_s23 = inlined_call_operand.hbm [shape: f32[1,128], index: 23, kind: input, shape index: {}]   ;;  %s5168_s24 = inlined_call_operand.hbm [shape: f32[2,8,128], index: 24, kind: output, shape index: {}]  }
   0x1   :  { %5188 = sst [smem:[#allocation36_spill]] %s5144_s0 }
   0x2   :  { %5189 = sst [smem:[#allocation37_spill]] %s5145_s1 }
   0x3   :  { %5190 = sst [smem:[#allocation38_spill]] %s5146_s2 }
   0x4   :  { %5191 = sst [smem:[#allocation39_spill]] %s5147_s3 }
   0x5   :  { %5192 = sst [smem:[#allocation40_spill]] %s5148_s4 }
   0x6   :  { %5193 = sst [smem:[#allocation41_spill]] %s5149_s5 }
   0x7   :  { %5194 = sst [smem:[#allocation42_spill]] %s5150_s6 }
   0x8   :  { %5195 = sst [smem:[#allocation43_spill]] %s5151_s7 }
   0x9   :  { %5196 = sst [smem:[#allocation44_spill]] %s5152_s8 }
   0xa   :  { %5197 = sst [smem:[#allocation45_spill]] %s5156_s12 }
   0xb   :  { %5198 = sst [smem:[#allocation46_spill]] %s5157_s13 }
   0xc   :  { %5199 = sst [smem:[#allocation47_spill]] %s5160_s16 }
   0xd   :  { %5200 = sst [smem:[#allocation48_spill]] %s5162_s18 }
   0xe   :  { %5201 = sst [smem:[#allocation49_spill]] %s5165_s21 }
   0xf   :  { %5202 = sst [smem:[#allocation50_spill]] %s5168_s24 }
  0x10   :  { %29 = vsyncpa [#allocation4], 0 }
  0x11   :  { %30 = vsyncpa [#allocation7], 0 }
  0x12   :  { %31 = vsyncpa [#allocation10], 0 }
  0x13   :  { %32 = vsyncpa [#allocation13], 0 }
  0x14   :  { %33 = vsyncpa [#allocation16], 0 }
  0x15   :  { %34 = vsyncpa [#allocation19], 0 }
  0x16   :  { %35 = vsyncpa [#allocation5], 0 }
  0x17   :  { %37 = vsyncpa [#allocation5 + $0x1], 0  ;;  %s4489_s5 = smov 0   ;;  %s4491_s26 = smov 0  }
  0x18   :  { %s4493_s27 = smov 0   ;;  %s4495_s28 = smov 0  }
  0x19 LB: > { %5203 = sst [smem:[#allocation28_spill]] %s4327_s5  ;;  %s4510_s6 = sadd.s32 4294967295, %s4339_s28   ;;  %s4339_s28 = sphi %s4495_s28, %s5257_s28   ;;  %s4335_s27 = sphi %s4493_s27, %s5260_s27   ;;  %s4331_s26 = sphi %s4491_s26, %s5259_s26   ;;  %s4327_s5 = sphi %s4489_s5, %s5258_s5  }
  0x1a   : > { %5204 = sst [smem:[#allocation29_spill]] %s4331_s26  ;;  %s3236_s2 = sadd.s32 4294967294, %s4339_s28  }
  0x1b   : > { %5205 = sst [smem:[#allocation30_spill]] %s4335_s27  ;;  %s4514_s29 = sadd.s32 1, %s4339_s28  }
  0x1c   : > { %5206 = sst [smem:[#allocation31_spill]] %s4339_s28  ;;  %s574_s0 = sadd.s32 1, %s4335_s27 }
  0x1d   : > { %5207 = sst [smem:[#allocation32_spill]] %s4514_s29  ;;  %s571_s7 = ssub.s32 %s4339_s28, %s4514_s29 }
  0x1e   : > { %p584_p0 = scmp.ne.s32.totalorder %s4335_s27, %s4331_s26  ;;  %p572_p1 = scmp.eq.s32.totalorder %s571_s7, 0 }
  0x1f   : > { %p585_p2 = scmp.eq.s32.totalorder %s4510_s6, 1  ;;  %p590_p3 = scmp.ne.s32.totalorder %s4331_s26, %s4327_s5 }
  0x20   : > { %p591_p4 = scmp.eq.s32.totalorder %s3236_s2, 1  ;;  %p3237_p7 = scmp.ge.s32.totalorder %s4339_s28, 1 }
  0x21   : > { %s4525_s30 = scalar_select %p572_p1, %s4335_s27, %s574_s0  }
  0x22   : > { %p4527_p5 = por %p585_p2, %p584_p0  ;;  %p4531_p6 = por %p591_p4, %p590_p3 }
  0x23   : > { %5208 = sst [smem:[#allocation33_spill]] %s4525_s30  ;;  %p598_p8 = scmp.lt.s32.totalorder %s4339_s28, 3 }
  0x24   : > { %s5209_s3 = scalar_select %p4527_p5, 1, 0 }
  0x25   : > { %s5211_s25 = scalar_select %p4531_p6, 1, 0 }
  0x26   : > { %5210 = sst [smem:[#allocation34_spill]] %s5209_s3  ;;  %p5178_p9 = scmp.eq.s32.totalorder %s4510_s6, 0 }
  0x27   : > { %5212 = sst [smem:[#allocation35_spill]] %s5211_s25  ;;  %p4538_p10 = pnand %p3237_p7, %p598_p8 }
  0x28   : > { %s4341_s4 = smov [#allocation6]   ;;  %s4342_s0 = smov [#allocation9]  }
  0x29   : > { %s5213_s8 = scalar_select %p4538_p10, 1, 0 }
  0x2a   : > { %s644_s1 = sshll.u32 %s4341_s4, 4  ;;  %p3699_p11 = pneg %p4538_p10  ;;  %s4544_s1 = int_to_ptr.vmem [resolvable:$true] %s644_s1 }
  0x2b   : > { %s676_s7 = sshll.u32 %s4342_s0, 4  ;;  %s4343_s30 = smov [#allocation12]   ;;  %s4552_s7 = int_to_ptr.vmem [resolvable:$true] %s676_s7 }
  0x2c   : > { %p4548_p12 = pnand %p5178_p9, %p3699_p11  ;;  %s4554_s27 = sshll.u32 %s4343_s30, 4  ;;  %s702_s27 = int_to_ptr.vmem [resolvable:$true] %s4554_s27 }
  0x2d   : > { %s5215_s12 = sld [smem:[#allocation45_spill]] }
  0x2e   : > { %p4564_p0 = pneg %p4548_p12 }
  0x33   : > { %s3973_s4 = scalar_lea.hbm %s5215_s12, 1024 }
  0x34   : > { %p3974_p13 = scmp.ne.s32.totalorder %s5215_s12, %s3973_s4  ;;  %p3980_p3 = scmp.lt.u32.totalorder %s3973_s4, %s5215_s12 }
  0x36   : > { %p3976_p1 = pnand %p4564_p0, %p3974_p13 }
  0x38   : > { %p3977_p2 = pneg %p3976_p1 }
  0x3a   : > { %p3982_p4 = pnand %p3980_p3, %p3977_p2 }
  0x3c   : > { %3985 = shalt.err (!%p3982_p4)
}
  0x3d   : > { %s3986_s5 = scalar_lea.vmem %s4544_s1, 1024  ;;  %p3994_p9 = scmp.lt.s32.totalorder %s4544_s1, %s4544_s1 }
  0x3e   : > { %p3987_p7 = scmp.ne.s32.totalorder %s4544_s1, %s3986_s5  ;;  %p3995_p6 = scmp.lt.s32.totalorder %s3986_s5, %s3986_s5 }
  0x40   : > { %p3989_p8 = pnand %p3987_p7, %p4564_p0  ;;  %p3996_p13 = por %p3995_p6, %p3994_p9 }
  0x42   : > { %p3990_p11 = pneg %p3989_p8 }
  0x44   : > { %p3997_p1 = pnand %p3996_p13, %p3990_p11 }
  0x46   : > { %4000 = shalt.err (!%p3997_p1)
}
  0x47   : > { %s5184_s28 = smov 64   ;;  %s5185_s29 = smov 4  }
  0x48   : > { %3705 = dma.hbm_to_vmem [thread:$0]  (!%p4548_p12), %s5215_s12, 1024, %s4544_s1, [#allocation7], %s5184_s28, %s5184_s28, %s5185_s29  }
  0x49   : > { %s5217_s16 = sld [smem:[#allocation47_spill]] }
  0x4f   : > { %s4001_s5 = scalar_lea.hbm %s5217_s16, 1024 }
  0x50   : > { %p4002_p6 = scmp.ne.s32.totalorder %s5217_s16, %s4001_s5  ;;  %p4008_p3 = scmp.lt.u32.totalorder %s4001_s5, %s5217_s16 }
  0x52   : > { %p4004_p9 = pnand %p4002_p6, %p4564_p0 }
  0x54   : > { %p4005_p2 = pneg %p4004_p9 }
  0x56   : > { %p4010_p4 = pnand %p4008_p3, %p4005_p2 }
  0x58   : > { %4013 = shalt.err (!%p4010_p4)
}
  0x59   : > { %s4014_s1 = scalar_lea.vmem %s4552_s7, 1024  ;;  %p4022_p13 = scmp.lt.s32.totalorder %s4552_s7, %s4552_s7 }
  0x5a   : > { %p4015_p7 = scmp.ne.s32.totalorder %s4552_s7, %s4014_s1  ;;  %p4023_p1 = scmp.lt.s32.totalorder %s4014_s1, %s4014_s1 }
  0x5c   : > { %p4017_p8 = pnand %p4015_p7, %p4564_p0  ;;  %p4024_p6 = por %p4023_p1, %p4022_p13 }
  0x5e   : > { %p4018_p11 = pneg %p4017_p8 }
  0x60   : > { %p4025_p9 = pnand %p4024_p6, %p4018_p11 }
  0x62   : > { %4028 = shalt.err (!%p4025_p9)
}
  0x63   : > { %3711 = dma.hbm_to_vmem [thread:$0]  (!%p4548_p12), %s5217_s16, 1024, %s4552_s7, [#allocation10], %s5184_s28, %s5184_s28, %s5185_s29  }
  0x64   : > { %s5218_s18 = sld [smem:[#allocation48_spill]] }
  0x6a   : > { %s4029_s25 = scalar_lea.hbm %s5218_s18, 16 }
  0x6b   : > { %p4030_p2 = scmp.ne.s32.totalorder %s5218_s18, %s4029_s25  ;;  %p4036_p7 = scmp.lt.u32.totalorder %s4029_s25, %s5218_s18 }
  0x6d   : > { %p4032_p3 = pnand %p4030_p2, %p4564_p0 }
  0x6f   : > { %p4033_p4 = pneg %p4032_p3 }
  0x71   : > { %p4038_p8 = pnand %p4036_p7, %p4033_p4 }
  0x73   : > { %4041 = shalt.err (!%p4038_p8)
}
  0x74   : > { %s4042_s1 = scalar_lea.vmem %s702_s27, 16  ;;  %s4049_s7 = scalar_lea.vmem %s702_s27, 32 }
  0x75   : > { %p4043_p11 = scmp.ne.s32.totalorder %s702_s27, %s4042_s1  ;;  %p4050_p6 = scmp.lt.s32.totalorder %s702_s27, %s702_s27 }
  0x76   : > { %p4051_p9 = scmp.lt.s32.totalorder %s4049_s7, %s4042_s1 }
  0x77   : > { %p4045_p13 = pnand %p4043_p11, %p4564_p0 }
  0x78   : > { %p4052_p5 = por %p4051_p9, %p4050_p6 }
  0x79   : > { %p4046_p1 = pneg %p4045_p13 }
  0x7b   : > { %p4053_p10 = pnand %p4052_p5, %p4046_p1 }
  0x7d   : > { %4056 = shalt.err (!%p4053_p10)
}
  0x7e   : > { %3717 = dma.hbm_to_vmem [thread:$0]  (!%p4548_p12), %s5218_s18, 16, %s702_s27, [#allocation13]  }
  0x7f   : > { %s4346_s26 = smov [#allocation15]   ;;  %s4347_s25 = smov [#allocation3]  }
  0x80   : > { %s722_s3 = sshll.u32 %s4346_s26, 4  ;;  %s616_s4 = sshll.u32 %s4347_s25, 4  ;;  %s723_s3 = int_to_ptr.vmem [resolvable:$true] %s722_s3  ;;  %s617_s4 = int_to_ptr.vmem [resolvable:$true] %s616_s4 }
  0x81   : > { %s4057_s5 = scalar_lea.hbm %s5164_s20, 2048 }
  0x82   : > { %p4058_p5 = scmp.ne.s32.totalorder %s5164_s20, %s4057_s5  ;;  %p4064_p3 = scmp.lt.u32.totalorder %s4057_s5, %s5164_s20 }
  0x84   : > { %p4060_p10 = pnand %p4058_p5, %p4564_p0 }
  0x86   : > { %p4061_p2 = pneg %p4060_p10 }
  0x88   : > { %p4066_p4 = pnand %p4064_p3, %p4061_p2 }
  0x8a   : > { %4069 = shalt.err (!%p4066_p4)
}
  0x8b   : > { %s4070_s27 = scalar_lea.vmem %s723_s3, 2048  ;;  %p4078_p13 = scmp.lt.s32.totalorder %s723_s3, %s723_s3 }
  0x8c   : > { %p4071_p7 = scmp.ne.s32.totalorder %s723_s3, %s4070_s27  ;;  %p4079_p1 = scmp.lt.s32.totalorder %s4070_s27, %s4070_s27 }
  0x8e   : > { %p4073_p8 = pnand %p4071_p7, %p4564_p0  ;;  %p4080_p6 = por %p4079_p1, %p4078_p13 }
  0x90   : > { %p4074_p11 = pneg %p4073_p8 }
  0x92   : > { %p4081_p9 = pnand %p4080_p6, %p4074_p11 }
  0x94   : > { %4084 = shalt.err (!%p4081_p9)
}
  0x95   : > { %s5186_s21 = smov 128   ;;  %s5187_s26 = smov 8  }
  0x96   : > { %3723 = dma.hbm_to_vmem [thread:$0]  (!%p4548_p12), %s5164_s20, 2048, %s723_s3, [#allocation16], %s5186_s21, %s5186_s21, %s5187_s26  }
  0x97   : > { %s5219_s5 = sld [smem:[#allocation42_spill]] }
  0x9d   : > { %s5220_s1 = smov %s5219_s5  ;;  %s4085_s7 = scalar_lea.hbm %s5219_s5, 3072 }
  0x9e   : > { %p4086_p5 = scmp.ne.s32.totalorder %s5220_s1, %s4085_s7  ;;  %p4092_p3 = scmp.lt.u32.totalorder %s4085_s7, %s5220_s1 }
  0xa0   : > { %p4088_p10 = pnand %p4086_p5, %p4564_p0 }
  0xa2   : > { %p4089_p2 = pneg %p4088_p10 }
  0xa4   : > { %p4094_p4 = pnand %p4092_p3, %p4089_p2 }
  0xa6   : > { %4097 = shalt.err (!%p4094_p4)
}
  0xa7   : > { %s4098_s28 = scalar_lea.vmem %s617_s4, 3072  ;;  %p4106_p13 = scmp.lt.s32.totalorder %s617_s4, %s617_s4 }
  0xa8   : > { %p4099_p7 = scmp.ne.s32.totalorder %s617_s4, %s4098_s28  ;;  %p4107_p1 = scmp.lt.s32.totalorder %s4098_s28, %s4098_s28 }
  0xaa   : > { %p4101_p8 = pnand %p4099_p7, %p4564_p0  ;;  %p4108_p6 = por %p4107_p1, %p4106_p13 }
  0xac   : > { %p4102_p11 = pneg %p4101_p8 }
  0xae   : > { %p4109_p9 = pnand %p4108_p6, %p4102_p11 }
  0xb0   : > { %4112 = shalt.err (!%p4109_p9)
}
  0xb1   : > { %s4350_s3 = smov 192   ;;  %s4351_s25 = smov 12  }
  0xb2   : > { %3702 = dma.hbm_to_vmem [thread:$0]  (!%p4548_p12), %s5220_s1, 3072, %s617_s4, [#allocation4], %s4350_s3, %s4350_s3, %s4351_s25  }
  0xb3   : > { %s4352_s0 = smov [#allocation8]   ;;  %s4353_s5 = smov [#allocation11]  }
  0xb4   : > { %s660_s30 = sshll.u32 %s4352_s0, 4  ;;  %s690_s7 = sshll.u32 %s4353_s5, 4  ;;  %s661_s30 = int_to_ptr.vmem [resolvable:$true] %s660_s30  ;;  %s691_s7 = int_to_ptr.vmem [resolvable:$true] %s690_s7 }
  0xb5   : > { %s4113_s28 = scalar_lea.hbm %s5158_s14, 2048 }
  0xb6   : > { %p4114_p5 = scmp.ne.s32.totalorder %s5158_s14, %s4113_s28  ;;  %p4120_p3 = scmp.lt.u32.totalorder %s4113_s28, %s5158_s14 }
  0xb8   : > { %p4116_p10 = pnand %p4114_p5, %p4564_p0 }
  0xba   : > { %p4117_p2 = pneg %p4116_p10 }
  0xbc   : > { %p4122_p4 = pnand %p4120_p3, %p4117_p2 }
  0xbe   : > { %4125 = shalt.err (!%p4122_p4)
}
  0xbf   : > { %s4126_s4 = scalar_lea.vmem %s661_s30, 2048  ;;  %p4134_p13 = scmp.lt.s32.totalorder %s661_s30, %s661_s30 }
  0xc0   : > { %p4127_p7 = scmp.ne.s32.totalorder %s661_s30, %s4126_s4  ;;  %p4135_p1 = scmp.lt.s32.totalorder %s4126_s4, %s4126_s4 }
  0xc2   : > { %p4129_p8 = pnand %p4127_p7, %p4564_p0  ;;  %p4136_p6 = por %p4135_p1, %p4134_p13 }
  0xc4   : > { %p4130_p11 = pneg %p4129_p8 }
  0xc6   : > { %p4137_p9 = pnand %p4136_p6, %p4130_p11 }
  0xc8   : > { %4140 = shalt.err (!%p4137_p9)
}
  0xc9   : > { %s5221_s21 = smov 8   ;;  %s5222_s26 = smov 128  }
  0xca   : > { %3708 = dma.hbm_to_vmem [thread:$0]  (!%p4548_p12), %s5158_s14, 2048, %s661_s30, [#allocation7], %s5222_s26, %s5222_s26, %s5221_s21  }
  0xcb   : > { %s4141_s12 = scalar_lea.hbm %s5161_s17, 16 }
  0xcc   : > { %p4142_p5 = scmp.ne.s32.totalorder %s5161_s17, %s4141_s12  ;;  %p4148_p3 = scmp.lt.u32.totalorder %s4141_s12, %s5161_s17 }
  0xce   : > { %p4144_p10 = pnand %p4142_p5, %p4564_p0 }
  0xd0   : > { %p4145_p2 = pneg %p4144_p10 }
  0xd2   : > { %p4150_p4 = pnand %p4148_p3, %p4145_p2 }
  0xd4   : > { %4153 = shalt.err (!%p4150_p4)
}
  0xd5   : > { %s4154_s27 = scalar_lea.vmem %s691_s7, 16  ;;  %s4161_s30 = scalar_lea.vmem %s691_s7, 32 }
  0xd6   : > { %p4155_p7 = scmp.ne.s32.totalorder %s691_s7, %s4154_s27  ;;  %p4162_p13 = scmp.lt.s32.totalorder %s691_s7, %s691_s7 }
  0xd7   : > { %p4163_p1 = scmp.lt.s32.totalorder %s4161_s30, %s4154_s27 }
  0xd8   : > { %p4157_p8 = pnand %p4155_p7, %p4564_p0 }
  0xd9   : > { %p4164_p6 = por %p4163_p1, %p4162_p13 }
  0xda   : > { %p4158_p11 = pneg %p4157_p8 }
  0xdc   : > { %p4165_p9 = pnand %p4164_p6, %p4158_p11 }
  0xde   : > { %4168 = shalt.err (!%p4165_p9)
}
  0xdf   : > { %3714 = dma.hbm_to_vmem [thread:$0]  (!%p4548_p12), %s5161_s17, 16, %s691_s7, [#allocation10]  }
  0xe0   : > { %s4354_s21 = smov [#allocation14]   ;;  %s4355_s16 = smov [#allocation17]  }
  0xe1   : > { %s712_s26 = sshll.u32 %s4354_s21, 4  ;;  %s738_s18 = sshll.u32 %s4355_s16, 4  ;;  %s713_s26 = int_to_ptr.vmem [resolvable:$true] %s712_s26  ;;  %s739_s18 = int_to_ptr.vmem [resolvable:$true] %s738_s18 }
  0xe2   : > { %s4169_s12 = scalar_lea.hbm %s5163_s19, 16 }
  0xe3   : > { %p4170_p5 = scmp.ne.s32.totalorder %s5163_s19, %s4169_s12  ;;  %p4176_p3 = scmp.lt.u32.totalorder %s4169_s12, %s5163_s19 }
  0xe5   : > { %p4172_p10 = pnand %p4170_p5, %p4564_p0 }
  0xe7   : > { %p4173_p2 = pneg %p4172_p10 }
  0xe9   : > { %p4178_p4 = pnand %p4176_p3, %p4173_p2 }
  0xeb   : > { %4181 = shalt.err (!%p4178_p4)
}
  0xec   : > { %s4182_s7 = scalar_lea.vmem %s713_s26, 16  ;;  %s4189_s27 = scalar_lea.vmem %s713_s26, 32 }
  0xed   : > { %p4183_p7 = scmp.ne.s32.totalorder %s713_s26, %s4182_s7  ;;  %p4190_p13 = scmp.lt.s32.totalorder %s713_s26, %s713_s26 }
  0xee   : > { %p4191_p1 = scmp.lt.s32.totalorder %s4189_s27, %s4182_s7 }
  0xef   : > { %p4185_p8 = pnand %p4183_p7, %p4564_p0 }
  0xf0   : > { %p4192_p6 = por %p4191_p1, %p4190_p13 }
  0xf1   : > { %p4186_p11 = pneg %p4185_p8 }
  0xf3   : > { %p4193_p9 = pnand %p4192_p6, %p4186_p11 }
  0xf5   : > { %4196 = shalt.err (!%p4193_p9)
}
  0xf6   : > { %3720 = dma.hbm_to_vmem [thread:$0]  (!%p4548_p12), %s5163_s19, 16, %s713_s26, [#allocation13]  }
  0xf7   : > { %s4197_s16 = scalar_lea.hbm %s5166_s22, 2048 }
  0xf8   : > { %p4198_p5 = scmp.ne.s32.totalorder %s5166_s22, %s4197_s16  ;;  %p4204_p3 = scmp.lt.u32.totalorder %s4197_s16, %s5166_s22 }
  0xfa   : > { %p4200_p10 = pnand %p4198_p5, %p4564_p0 }
  0xfc   : > { %p4201_p2 = pneg %p4200_p10 }
  0xfe   : > { %p4206_p4 = pnand %p4204_p3, %p4201_p2 }
 0x100   : > { %4209 = shalt.err (!%p4206_p4)
}
 0x101   : > { %s4210_s0 = scalar_lea.vmem %s739_s18, 2048  ;;  %p4218_p13 = scmp.lt.s32.totalorder %s739_s18, %s739_s18 }
 0x102   : > { %p4211_p7 = scmp.ne.s32.totalorder %s739_s18, %s4210_s0  ;;  %p4219_p1 = scmp.lt.s32.totalorder %s4210_s0, %s4210_s0 }
 0x104   : > { %p4213_p8 = pnand %p4211_p7, %p4564_p0  ;;  %p4220_p6 = por %p4219_p1, %p4218_p13 }
 0x106   : > { %p4214_p11 = pneg %p4213_p8 }
 0x108   : > { %p4221_p9 = pnand %p4220_p6, %p4214_p11 }
 0x10a   : > { %4224 = shalt.err (!%p4221_p9)
}
 0x10b   : > { %s5223_s26 = smov 4   ;;  %s5224_s5 = smov 64  }
 0x10c   : > { %3726 = dma.hbm_to_vmem [thread:$0]  (!%p4548_p12), %s5166_s22, 2048, %s739_s18, [#allocation16], %s5224_s5, %s5224_s5, %s5223_s26  }
 0x10d   : > { %s4356_s27 = smov [#allocation18]   ;;  %s4225_s21 = scalar_lea.hbm %s5167_s23, 16 }
 0x10e   : > { %s752_s30 = sshll.u32 %s4356_s27, 4  ;;  %p4226_p5 = scmp.ne.s32.totalorder %s5167_s23, %s4225_s21  ;;  %s753_s30 = int_to_ptr.vmem [resolvable:$true] %s752_s30 }
 0x10f   : > { %p4232_p3 = scmp.lt.u32.totalorder %s4225_s21, %s5167_s23 }
 0x110   : > { %p4228_p10 = pnand %p4226_p5, %p4564_p0 }
 0x112   : > { %p4229_p2 = pneg %p4228_p10 }
 0x114   : > { %p4234_p4 = pnand %p4232_p3, %p4229_p2 }
 0x116   : > { %4237 = shalt.err (!%p4234_p4)
}
 0x117   : > { %s4238_s18 = scalar_lea.vmem %s753_s30, 16  ;;  %s4245_s29 = scalar_lea.vmem %s753_s30, 32 }
 0x118   : > { %p4239_p7 = scmp.ne.s32.totalorder %s753_s30, %s4238_s18  ;;  %p4246_p13 = scmp.lt.s32.totalorder %s753_s30, %s753_s30 }
 0x119   : > { %p4247_p1 = scmp.lt.s32.totalorder %s4245_s29, %s4238_s18 }
 0x11a   : > { %p4241_p8 = pnand %p4239_p7, %p4564_p0 }
 0x11b   : > { %p4248_p6 = por %p4247_p1, %p4246_p13 }
 0x11c   : > { %p4242_p11 = pneg %p4241_p8 }
 0x11e   : > { %p4249_p9 = pnand %p4248_p6, %p4242_p11 }
 0x120   : > { %4252 = shalt.err (!%p4249_p9)
}
 0x121   : > { %3729 = dma.hbm_to_vmem [thread:$0]  (!%p4548_p12), %s5167_s23, 16, %s753_s30, [#allocation19]  }
 0x122   : > { %p5225_p5 = scmp.ne.s32.totalorder %s5213_s8, 0 }
 0x123   : > { %p5226_p10 = scmp.eq.s32.totalorder (!%p5225_p5), %s4510_s6, 0 }
 0x124   : > { %792 = sbr.rel (%p5225_p5) target bundleno = 5470 (0x155e), region = 116 }
 0x12b   : > { %4298 = dma.done.wait (%p5226_p10), [#allocation4], 3072   ;;  %p5227_p0 = pmov %p5226_p10 }
 0x12d   : > { %4300 = vsyncadd (%p5227_p0), [#allocation4], 4294964224  ;;  %p5228_p2 = pmov %p5227_p0 }
 0x12e   : > { %p5229_p3 = pmov %p5227_p0 }
 0x12f   : > { %4302 = dma.done.wait (%p5228_p2), [#allocation7], 3072  }
 0x130   : > { %4304 = vsyncadd (%p5229_p3), [#allocation7], 4294964224  ;;  %p5230_p4 = pmov %p5227_p0 }
 0x131   : > { %p5231_p12 = pmov %p5227_p0 }
 0x132   : > { %4306 = dma.done.wait (%p5230_p4), [#allocation10], 1040  }
 0x133   : > { %4308 = vsyncadd (%p5231_p12), [#allocation10], 4294966256  ;;  %p5232_p7 = pmov %p5227_p0 }
 0x134   : > { %p5233_p8 = pmov %p5227_p0 }
 0x135   : > { %4310 = dma.done.wait (%p5232_p7), [#allocation13], 32  }
 0x136   : > { %4312 = vsyncadd (%p5233_p8), [#allocation13], 4294967264  ;;  %p5234_p11 = pmov %p5227_p0 }
 0x137   : > { %p5235_p13 = pmov %p5227_p0 }
 0x138   : > { %4314 = dma.done.wait (%p5234_p11), [#allocation16], 4096  }
 0x139   : > { %4316 = vsyncadd (%p5235_p13), [#allocation16], 4294963200  ;;  %p5236_p1 = pmov %p5227_p0 }
 0x13a   : > { %p5237_p6 = pmov %p5227_p0 }
 0x13b   : > { %4318 = dma.done.wait (%p5236_p1), [#allocation19], 16  }
 0x13c   : > { %4320 = vsyncadd (%p5237_p6), [#allocation19], 4294967280  ;;  %p904_p9 = scmp.lt.s32.totalorder %s4510_s6, 1  ;;  %s5238_s13 = sld [smem:[#allocation36_spill]]  ;;  %v3809_v5 = vld [vmem:[#allocation3 + $0x4] ss:$12 sps:$4 sm:$0xff]   ;;  %v993_v46 = vlaneseq }
 0x13d   : > { %v3811_v6 = vld [vmem:[#allocation3] ss:$12 sps:$4 sm:$0xff]   ;;  %v3812_v7 = vld [vmem:[#allocation3 + $0x8] ss:$12 sps:$4 sm:$0xff]   ;;  %1136 = vmatprep.subr.bf16.mxu0 %v3809_v5  ;;  %v4357_v8 = vmov 0.0   ;;  %v4358_v22 = vmov 0  }
 0x13e   : > { %s4796_s24 = scalar_select %p904_p9, %s4510_s6, 1  ;;  %3481 = vmatprep.subr.bf16.mxu1 %v4357_v8  ;;  %1137 = vmatpush1.bf16.msra.mxu0 %v3811_v6  ;;  %v3813_v9 = vld [vmem:[#allocation3 + $0x1c] ss:$12 sps:$4 sm:$0xff]   ;;  %v3815_v10 = vld [vmem:[#allocation3 + $0x18] ss:$12 sps:$4 sm:$0xff]   ;;  %vm4359_vm0 = vmmov 0  }
 0x13f   : > { %3482 = vmatpush3.bf16.msra.mxu1 %v3812_v7  ;;  %v3816_v11 = vld [vmem:[#allocation3 + $0x20] ss:$12 sps:$4 sm:$0xff]   ;;  %1138 = vmatprep.subr.bf16.mxu0 %v3813_v9  ;;  %v3819_v13 = vld [vmem:[#allocation3 + $0x30] ss:$12 sps:$4 sm:$0xff]   ;;  %v3820_v14 = vld [vmem:[#allocation3 + $0x38] ss:$12 sps:$4 sm:$0xff]  }
 0x140   : > { %s4799_s8 = sshll.u32 %s4796_s24, 3  ;;  %3483 = vmatprep.subr.bf16.mxu1 %v4357_v8  ;;  %v3817_v12 = vld [vmem:[#allocation3 + $0x34] ss:$12 sps:$4 sm:$0xff]   ;;  %v3821_v15 = vld [vmem:[#allocation3 + $0x4c] ss:$12 sps:$4 sm:$0xff]   ;;  %1168 = vmatprep.mubr.bf16.mxu0 %v4358_v22  ;;  %s5239_s28 = sld [smem:[#allocation40_spill]] }
 0x141   : > { %v3823_v16 = vld [vmem:[#allocation3 + $0x48] ss:$12 sps:$4 sm:$0xff]   ;;  %v3824_v17 = vld [vmem:[#allocation3 + $0x50] ss:$12 sps:$4 sm:$0xff]   ;;  %v3827_v19 = vld [vmem:[#allocation3 + $0x60] ss:$12 sps:$4 sm:$0xff]   ;;  %3497 = vmatprep.mubr.msk.bf16.mxu1 %vm4359_vm0, %v4357_v8 }
 0x142   : > { %s907_s7 = scalar_lea.vmem %s5238_s13, %s4799_s8  ;;  %1139 = vmatpush1.bf16.msra.mxu0 %v3815_v10  ;;  %v3825_v18 = vld [vmem:[#allocation3 + $0x64] ss:$12 sps:$4 sm:$0xff]   ;;  %v3828_v20 = vld [vmem:[#allocation3 + $0x68] ss:$12 sps:$4 sm:$0xff]   ;;  %v3832_v24 = vld [vmem:[#allocation3 + $0x80] ss:$12 sps:$4 sm:$0xff]  }
 0x143   : > { %v4805_v0 = vld [vmem:[%s907_s7] sm:$0xff]  ;;  %3484 = vmatpush3.bf16.msra.mxu1 %v3816_v11  ;;  %1140 = vmatprep.subr.bf16.mxu0 %v3817_v12  ;;  %v3833_v25 = vld [vmem:[#allocation3 + $0x94] ss:$12 sps:$4 sm:$0xff]   ;;  %s5240_s16 = sld [smem:[#allocation41_spill]]  ;;  %v994_v47 = vshrl.u32 %v993_v46, 7  ;;  %s5241_s12 = sld [smem:[#allocation43_spill]] }
 0x144   : > { %924 = vadd.xlane.f32.xlu0 %v4805_v0  ;;  %3485 = vmatprep.subr.bf16.mxu1 %v4357_v8  ;;  %v3829_v21 = vld [vmem:[#allocation3 + $0x7c] ss:$12 sps:$4 sm:$0xff]   ;;  %v3831_v23 = vld [vmem:[#allocation3 + $0x78] ss:$12 sps:$4 sm:$0xff]   ;;  %vm1221_vm3 = vcmask 261120   ;;  %s4360_s18 = smov 96  }
 0x145   : > { %v3835_v26 = vld [vmem:[#allocation3 + $0x90] ss:$12 sps:$4 sm:$0xff]   ;;  %v3836_v27 = vld [vmem:[#allocation3 + $0x98] ss:$12 sps:$4 sm:$0xff]   ;;  %v3839_v29 = vld [vmem:[#allocation3 + $0xa8] ss:$12 sps:$4 sm:$0xff]  }
 0x146   : > { %1141 = vmatpush1.bf16.msra.mxu0 %v3819_v13  ;;  %v3837_v28 = vld [vmem:[#allocation3 + $0xac] ss:$12 sps:$4 sm:$0xff]   ;;  %v3840_v30 = vld [vmem:[#allocation3 + $0xb0] ss:$12 sps:$4 sm:$0xff]   ;;  %v4837_v48 = vsub.s32 1, %v994_v47  ;;  %v1003_v50 = vsub.s32 2, %v994_v47 }
 0x147   : > { %3486 = vmatpush3.bf16.msra.mxu1 %v3820_v14  ;;  %1142 = vmatprep.subr.bf16.mxu0 %v3821_v15  ;;  %v3264_v39 = vld [vmem:[%s5239_s28] ss:$0 sm:$0xff]  ;;  %v4843_v52 = vsub.s32 0, %v994_v47  ;;  %s4361_s29 = smov 32   ;;  %vm1284_vm4 = vcmask 1043456   ;;  %s5242_s2 = sld [smem:[#allocation38_spill]] }
 0x148   : > { %3487 = vmatprep.subr.bf16.mxu1 %v4357_v8  ;;  %vm1268_vm5 = vcmask 64512   ;;  %s4362_s13 = smov 64   ;;  %s5243_s30 = sld [smem:[#allocation44_spill]]  ;;  %vm1446_vm6 = vcmask 523520   ;;  %vm1562_vm7 = vcmask 785920   ;;  %vm1678_vm8 = vcmask 1048320  }
 0x149   : > { %v3265_v42 = vld [vmem:[%s5240_s16] ss:$0 sm:$0xff]  ;;  %s5244_s25 = sld [smem:[#allocation37_spill]]  ;;  %s5245_s4 = sld [smem:[#allocation46_spill]] }
 0x14a   : > { %1143 = vmatpush1.bf16.msra.mxu0 %v3823_v16  ;;  %v991_v49 = vld [vmem:[%s5241_s12] sm:$0x7]  ;;  %s5246_s3 = sld [smem:[#allocation39_spill]]  ;;  %s5249_s0 = sld [smem:[#allocation34_spill]] }
 0x14b   : > { %3488 = vmatpush3.bf16.msra.mxu1 %v3824_v17  ;;  %1144 = vmatprep.subr.bf16.mxu0 %v3825_v18  ;;  %v1000_v51 = vrot.slane %v991_v49, %v4837_v48  ;;  %v1004_v57 = vrot.slane %v991_v49, %v1003_v50  ;;  %v996_v63 = vrot.slane %v991_v49, %v4843_v52  ;;  %s3388_s26 = sshll.u32 %s4510_s6, 7  ;;  %s5250_s28 = sld [smem:[#allocation50_spill]] }
 0x14c   : > { %3489 = vmatprep.subr.bf16.mxu1 %v4357_v8  ;;  %s4363_s6 = smov [#allocation20]  }
 0x14d   : > { %s915_s5 = scalar_lea.vmem %s5242_s2, %s4799_s8 }
 0x14e   : > { %1145 = vmatpush1.bf16.msra.mxu0 %v3827_v19  ;;  %v4862_v9 = vld [vmem:[%s915_s5] sm:$0xff] }
 0x14f   : > { %3490 = vmatpush3.bf16.msra.mxu1 %v3828_v20  ;;  %1146 = vmatprep.subr.bf16.mxu0 %v3829_v21  ;;  %s911_s12 = scalar_lea.vmem %s5244_s25, %s4799_s8 }
 0x150   : > { %3491 = vmatprep.subr.bf16.mxu1 %v4357_v8  ;;  %s918_s25 = scalar_lea.vmem %s5246_s3, %s4796_s24  ;;  %p5252_p10 = scmp.ne.s32.totalorder %s5249_s0, 0 }
 0x151   : > { %s5102_s21 = scalar_lea.hbm %s5250_s28, %s3388_s26 }
 0x152   : > { %1147 = vmatpush1.bf16.msra.mxu0 %v3831_v23 }
 0x153   : > { %3492 = vmatpush3.bf16.msra.mxu1 %v3832_v24  ;;  %1148 = vmatprep.subr.bf16.mxu0 %v3833_v25 }
 0x154   : > { %3493 = vmatprep.subr.bf16.mxu1 %v4357_v8 }
 0x156   : > { %1149 = vmatpush1.bf16.msra.mxu0 %v3835_v26 }
 0x157   : > { %3494 = vmatpush3.bf16.msra.mxu1 %v3836_v27  ;;  %1150 = vmatprep.subr.bf16.mxu0 %v3837_v28 }
 0x158   : > { %3495 = vmatprep.subr.bf16.mxu1 %v4357_v8 }
 0x15a   : > { %1151 = vmatpush1.bf16.msra.mxu0 %v3839_v29 }
 0x15b   : > { %3496 = vmatpush3.bf16.msra.mxu1 %v3840_v30  ;;  %3525 = vmatprep.subr.bf16.mxu0 %v4357_v8 }
 0x15c   : > { %3501 = vmatprep.subr.bf16.mxu1 %v4357_v8 }
 0x1d1   : > { %v925_v1 = vpop.xlane.xlu0 %924 }
 0x1d2   : > { %v927_v2 = vmul.f32 0.0078125, %v925_v1 }
 0x1d4   : > { %v4809_v3 = vsub.f32 %v4805_v0, %v927_v2 }
 0x1d6   : > { %v929_v4 = vmul.f32 %v4809_v3, %v4809_v3  ;;  %v947_v40 = vmul.f32 %v3264_v39, %v4809_v3 }
 0x1d8   : > { %930 = vadd.xlane.f32.xlu0 %v929_v4 }
 0x265   : > { %v931_v31 = vpop.xlane.xlu0 %930 }
 0x266   : > { %v933_v32 = vmul.f32 0.007874016, %v931_v31 }
 0x268   : > { %3929 = vrsqrt.f32 %v933_v32  ;;  %vm936_vm1 = vcmp.eq.f32.partialorder %v933_v32, inf  ;;  %v939_v35 = vand.u32 2147483648, %v933_v32  ;;  %vm938_vm2 = vcmp.eq.f32.partialorder %v933_v32, 0.0 }
 0x272   : > { %v3930_v33 = vpop.eup %3929 }
 0x273   : > { %v935_v34 = vmul.f32 %v3930_v33, %v933_v32 }
 0x275   : > { %v937_v36 = vsel %vm936_vm1, %v933_v32, %v935_v34 }
 0x276   : > { %v940_v37 = vsel %vm938_vm2, %v939_v35, %v937_v36 }
 0x277   : > { %v948_v38 = vadd.f32 1e-06, %v940_v37 }
 0x279   : > { %3931 = vrcp.f32 %v948_v38 }
 0x283   : > { %v3932_v41 = vpop.eup %3931 }
 0x284   : > { %v950_v43 = vmul.f32 %v3932_v41, %v947_v40 }
 0x286   : > { %v957_v44 = vadd.f32 %v3265_v42, %v950_v43 }
 0x288   : > { %v958_v45 = vpack.c.bf16 %v957_v44, %v957_v44 }
 0x28a   : > { %1169 = vmatmul.mubr.bf16.vlgmr.msra.gmra.mrb[0].mxu0 %v958_v45  ;;  %3498 = vmatmul.mubr.bf16.vlgmr.msra.gmra.mrb[0].mxu1 %v958_v45 }
 0x28b   : > { %3503 = vmatprep.mubr.msk.bf16.mxu1 %vm4359_vm0, %v4357_v8  ;;  %3527 = vmatprep.mubr.msk.bf16.mxu0 %vm4359_vm0, %v4357_v8 }
 0x35d   : > { %v1170_v53 = vpop.f32.mrb[0].mxu0  ;;  %v1211_v54 = vpop.f32.mrb[0].mxu1 }
 0x35e   : > { %v1172_v55 = vpop.f32.mrb[1].mxu0  ;;  %v3499_v56 = vpop.f32.mrb[1].mxu1  ;;  %v1212_v2 = vadd.f32 %v1211_v54, %v1004_v57  ;;  %v1171_v4 = vadd.f32 %v1170_v53, %v996_v63 }
 0x35f   : > { %v1173_v58 = vadd.f32 %v1172_v55, %v1000_v51  ;;  %v1174_v59 = vpop.f32.mrb[2].mxu0  ;;  %v1214_v60 = vpop.f32.mrb[2].mxu1 }
 0x360   : > { %v1175_v61 = vpop.f32.mrb[3].mxu0  ;;  %v3500_v62 = vpop.f32.mrb[3].mxu1  ;;  %v4849_v5 = vpack.c.bf16 %v1212_v2, %v1212_v2  ;;  %v1218_v6 = vpack.c.bf16 %v1171_v4, %v1171_v4 }
 0x361   : > { %v1219_v1 = vpack.c.bf16 %v1173_v58, %v1173_v58 }
 0x362   : > { %v1286_v7 = vsel %vm1284_vm4, %v4849_v5, 0 }
 0x363   : > { %1333 = vrot.lane.b32.xlu0 %v1219_v1, %s4360_s18  ;;  %v1226_v3 = vsel %vm1221_vm3, %v1219_v1, 0 }
 0x364   : > { %3502 = vmatpush3.bf16.xpose.msra.mxu1 %v1226_v3 }
 0x365   : > { %3507 = vmatprep.subr.bf16.mxu1 %v4357_v8 }
 0x367   : > { %1566 = vrot.lane.b32.xlu0 %v1219_v1, %s4361_s29 }
 0x36b   : > { %3504 = vmatmul.mubr.msk.bf16.vlgmr.msra.gmra.mrb[4].mxu1 %vm1221_vm3, %v1218_v6 }
 0x36c   : > { %3508 = vmatpush3.bf16.msra.mxu1 %v1286_v7  ;;  %3509 = vmatprep.mubr.msk.bf16.mxu1 %vm4359_vm0, %v4357_v8 }
 0x36d   : > { %3513 = vmatprep.subr.bf16.mxu1 %v4357_v8 }
 0x3d5   : > { %v1334_v24 = vpop.permute.xlu0 %1333 }
 0x3d6   : > { %v1339_v31 = vsel %vm1221_vm3, %v1334_v24, 0 }
 0x3d9   : > { %v1567_v29 = vpop.permute.xlu0 %1566 }
 0x3da   : > { %v1572_v33 = vsel %vm1221_vm3, %v1567_v29, 0 }
 0x43e   : > { %v1262_v10 = vpop.f32.mrb[4].mxu1 }
 0x43f   : > { %v1263_v11 = vadd.f32 %v1262_v10, %v4862_v9  ;;  %v3505_v12 = vpop.f32.mrb[5].mxu1 }
 0x440   : > { %v1265_v13 = vpop.f32.mrb[6].mxu1 }
 0x441   : > { %v3506_v14 = vpop.f32.mrb[7].mxu1  ;;  %v1269_v15 = vsel %vm1268_vm5, %v1263_v11, -inf }
 0x442   : > { %1270 = vmax.xlane.f32.xlu1 %v1269_v15 }
 0x4cf   : > { %v1271_v16 = vpop.xlane.xlu1 %1270 }
 0x4d0   : > { %v1272_v17 = vsub.f32 %v1263_v11, %v1271_v16 }
 0x4d2   : > { %v1273_v18 = vmul.f32 1.442695, %v1272_v17 }
 0x4d4   : > { %3933 = vpow2.f32 %v1273_v18 }
 0x4de   : > { %v3934_v19 = vpop.eup %3933 }
 0x4df   : > { %v1275_v20 = vsel %vm1268_vm5, %v3934_v19, 0.0 }
 0x4e0   : > { %1276 = vadd.xlane.f32.xlu1 %v1275_v20 }
 0x4f1   : > { %1330 = vrot.lane.b32.xlu1 %v1218_v6, %s4360_s18 }
 0x4f5   : > { %1450 = vrot.lane.b32.xlu1 %v1219_v1, %s4362_s13 }
 0x4f9   : > { %1448 = vrot.lane.b32.xlu1 %v1218_v6, %s4362_s13 }
 0x4fd   : > { %1564 = vrot.lane.b32.xlu1 %v1218_v6, %s4361_s29 }
 0x56d   : > { %v1277_v21 = vpop.xlane.xlu1 %1276 }
 0x56e   : > { %3935 = vrcp.f32 %v1277_v21 }
 0x571   : > { %v1331_v23 = vpop.permute.xlu1 %1330 }
 0x575   : > { %v1451_v25 = vpop.permute.xlu1 %1450 }
 0x576   : > { %v1456_v26 = vsel %vm1221_vm3, %v1451_v25, 0 }
 0x577   : > { %3526 = vmatpush3.bf16.xpose.msra.mxu0 %v1456_v26 }
 0x578   : > { %v3936_v27 = vpop.eup %3935  ;;  %3537 = vmatprep.subr.bf16.mxu0 %v4357_v8 }
 0x579   : > { %v1279_v28 = vmul.f32 %v3936_v27, %v3934_v19  ;;  %v1449_v32 = vpop.permute.xlu1 %1448 }
 0x57b   : > { %v1280_v30 = vpack.c.bf16 %v1279_v28, %v1279_v28 }
 0x57d   : > { %3510 = vmatmul.mubr.msk.bf16.vlgmr.msra.gmra.mrb[8].mxu1 %vm1268_vm5, %v1280_v30  ;;  %v1565_v34 = vpop.permute.xlu1 %1564 }
 0x57e   : > { %3514 = vmatpush3.bf16.xpose.msra.mxu1 %v1339_v31  ;;  %3528 = vmatmul.mubr.msk.bf16.vlgmr.msra.gmra.mrb[4].mxu0 %vm1221_vm3, %v1449_v32  ;;  %v3841_v31 = vld [vmem:[%s5243_s30] sm:$0xff]   ;;  %v3842_v32 = vld [vmem:[%s5243_s30 + $0x8] sm:$0xff]  }
 0x57f   : > { %3538 = vmatpush3.bf16.xpose.msra.mxu0 %v1572_v33  ;;  %3515 = vmatprep.mubr.msk.bf16.mxu1 %vm4359_vm0, %v4357_v8  ;;  %v3843_v33 = vld [vmem:[%s5243_s30 + $0x10] sm:$0xff]  }
 0x580   : > { %3539 = vmatprep.mubr.msk.bf16.mxu0 %vm4359_vm0, %v4357_v8  ;;  %3519 = vmatprep.subr.bf16.mxu1 %v4357_v8 }
 0x581   : > { %3549 = vmatprep.subr.bf16.mxu0 %v4357_v8 }
 0x585   : > { %3516 = vmatmul.mubr.msk.bf16.vlgmr.msra.gmra.mrb[12].mxu1 %vm1221_vm3, %v1331_v23 }
 0x586   : > { %3540 = vmatmul.mubr.msk.bf16.vlgmr.msra.gmra.mrb[8].mxu0 %vm1221_vm3, %v1565_v34  ;;  %3521 = vmatprep.mubr.msk.bf16.mxu1 %vm4359_vm0, %v4357_v8  ;;  %v3844_v34 = vld [vmem:[%s5243_s30 + $0x18] sm:$0xff]  }
 0x587   : > { %3565 = vmatprep.mubr.msk.bf16.mxu0 %vm4359_vm0, %v4357_v8  ;;  %3550 = vmatpush3.bf16.msra.mxu0 %v3841_v31  ;;  %v3879_v31 = vld [vmem:[#allocation6 + $0x30] sm:$0xff]  }
 0x588   : > { %3551 = vmatprep.subr.bf16.mxu0 %v4357_v8 }
 0x58b   : > { %3552 = vmatpush3.bf16.msra.mxu0 %v3842_v32  ;;  %v3880_v32 = vld [vmem:[#allocation6 + $0x38] sm:$0xff]  }
 0x58c   : > { %3553 = vmatprep.subr.bf16.mxu0 %v4357_v8 }
 0x58f   : > { %3554 = vmatpush3.bf16.msra.mxu0 %v3843_v33 }
 0x590   : > { %3555 = vmatprep.subr.bf16.mxu0 %v4357_v8 }
 0x593   : > { %3556 = vmatpush3.bf16.msra.mxu0 %v3844_v34 }
 0x594   : > { %3557 = vmatprep.subr.bf16.mxu0 %v4357_v8 }
 0x650   : > { %v1322_v35 = vpop.f32.mrb[8].mxu1 }
 0x651   : > { %1328 = vst.msk [vmem:[#allocation2] sm:$0xff] %vm1221_vm3, %v1322_v35  ;;  %v3511_v36 = vpop.f32.mrb[9].mxu1  ;;  %v1492_v37 = vpop.f32.mrb[4].mxu0  ;;  %v3845_v35 = vld [vmem:[%s5243_s30 + $0x20] sm:$0xff]  }
 0x652   : > { %v1493_v38 = vadd.f32 %v1492_v37, %v4862_v9  ;;  %v1325_v39 = vpop.f32.mrb[10].mxu1  ;;  %v3529_v40 = vpop.f32.mrb[5].mxu0  ;;  %3558 = vmatpush3.bf16.msra.mxu0 %v3845_v35  ;;  %v3846_v36 = vld [vmem:[%s5243_s30 + $0x28] sm:$0xff]  }
 0x653   : > { %v3512_v41 = vpop.f32.mrb[11].mxu1  ;;  %v1495_v42 = vpop.f32.mrb[6].mxu0  ;;  %3559 = vmatprep.subr.bf16.mxu0 %v4357_v8 }
 0x654   : > { %v3530_v43 = vpop.f32.mrb[7].mxu0  ;;  %v1498_v44 = vsel %vm1268_vm5, %v1493_v38, -inf  ;;  %v3847_v41 = vld [vmem:[%s5243_s30 + $0x30] sm:$0xff]   ;;  %v3848_v42 = vld [vmem:[%s5243_s30 + $0x38] sm:$0xff]  }
 0x655   : > { %1499 = vmax.xlane.f32.xlu1 %v1498_v44 }
 0x656   : > { %3560 = vmatpush3.bf16.msra.mxu0 %v3846_v36 }
 0x657   : > { %3561 = vmatprep.subr.bf16.mxu0 %v4357_v8 }
 0x658   : > { %v1375_v45 = vpop.f32.mrb[12].mxu1 }
 0x659   : > { %v1376_v46 = vadd.f32 %v1375_v45, %v4862_v9  ;;  %v3517_v47 = vpop.f32.mrb[13].mxu1  ;;  %v1608_v49 = vpop.f32.mrb[8].mxu0 }
 0x65a   : > { %v1378_v50 = vpop.f32.mrb[14].mxu1  ;;  %v3541_v51 = vpop.f32.mrb[9].mxu0  ;;  %v1609_v53 = vadd.f32 %v1608_v49, %v4862_v9  ;;  %3562 = vmatpush3.bf16.msra.mxu0 %v3847_v41  ;;  %v3307_v41 = vld [vmem:[%s5154_s10] ss:$0 sm:$0xff] }
 0x65b   : > { %v3518_v54 = vpop.f32.mrb[15].mxu1  ;;  %v1611_v55 = vpop.f32.mrb[10].mxu0  ;;  %v1381_v56 = vsel %vm1268_vm5, %v1376_v46, -inf  ;;  %3563 = vmatprep.subr.bf16.mxu0 %v4357_v8 }
 0x65c   : > { %v3542_v57 = vpop.f32.mrb[11].mxu0  ;;  %1382 = vmax.xlane.f32.xlu0 %v1381_v56  ;;  %v1614_v58 = vsel %vm1268_vm5, %v1609_v53, -inf }
 0x65e   : > { %3564 = vmatpush3.bf16.msra.mxu0 %v3848_v42 }
 0x660   : > { %1615 = vmax.xlane.f32.xlu0 %v1614_v58  ;;  %v3298_v58 = vld [vmem:[%s5153_s9] ss:$0 sm:$0xff] }
 0x6e2   : > { %v1500_v59 = vpop.xlane.xlu1 %1499 }
 0x6e3   : > { %v1501_v60 = vsub.f32 %v1493_v38, %v1500_v59 }
 0x6e5   : > { %v1502_v61 = vmul.f32 1.442695, %v1501_v60 }
 0x6e7   : > { %3937 = vpow2.f32 %v1502_v61 }
 0x6e9   : > { %v1383_v62 = vpop.xlane.xlu0 %1382 }
 0x6ea   : > { %v1384_v63 = vsub.f32 %v1376_v46, %v1383_v62 }
 0x6ec   : > { %v1385_v1 = vmul.f32 1.442695, %v1384_v63 }
 0x6ed   : > { %v1616_v2 = vpop.xlane.xlu0 %1615 }
 0x6ee   : > { %3939 = vpow2.f32 %v1385_v1  ;;  %v1617_v3 = vsub.f32 %v1609_v53, %v1616_v2  ;;  %v3849_v2 = vld [vmem:[#allocation8] ss:$8 sps:$4 sm:$0xff]  }
 0x6f0   : > { %v1618_v4 = vmul.f32 1.442695, %v1617_v3  ;;  %v3851_v3 = vld [vmem:[#allocation8 + $0x4] ss:$8 sps:$4 sm:$0xff]  }
 0x6f1   : > { %v3938_v6 = vpop.eup %3937  ;;  %2049 = vmatprep.subr.bf16.mxu0 %v3851_v3 }
 0x6f2   : > { %3941 = vpow2.f32 %v1618_v4  ;;  %v1504_v7 = vsel %vm1268_vm5, %v3938_v6, 0.0  ;;  %v3854_v4 = vld [vmem:[#allocation8 + $0x14] ss:$8 sps:$4 sm:$0xff]  }
 0x6f3   : > { %1505 = vadd.xlane.f32.xlu0 %v1504_v7 }
 0x6f8   : > { %v3940_v9 = vpop.eup %3939 }
 0x6f9   : > { %v1387_v10 = vsel %vm1268_vm5, %v3940_v9, 0.0 }
 0x6fa   : > { %1388 = vadd.xlane.f32.xlu0 %v1387_v10 }
 0x6fc   : > { %v3942_v11 = vpop.eup %3941 }
 0x6fd   : > { %v1620_v12 = vsel %vm1268_vm5, %v3942_v11, 0.0 }
 0x6fe   : > { %1621 = vadd.xlane.f32.xlu1 %v1620_v12  ;;  %v3855_v12 = vld [vmem:[#allocation8 + $0x20] ss:$8 sps:$4 sm:$0xff]  }
 0x70f   : > { %1510 = vrot.lane.b32.xlu1 %v4849_v5, %s4362_s13 }
 0x710   : > { %1394 = vrot.lane.b32.xlu0 %v4849_v5, %s4360_s18 }
 0x713   : > { %1626 = vrot.lane.b32.xlu1 %v4849_v5, %s4361_s29 }
 0x780   : > { %v1506_v13 = vpop.xlane.xlu0 %1505 }
 0x787   : > { %v1389_v14 = vpop.xlane.xlu0 %1388 }
 0x788   : > { %3943 = vrcp.f32 %v1389_v14  ;;  %v3861_v14 = vld [vmem:[#allocation8 + $0x34] ss:$8 sps:$4 sm:$0xff]  }
 0x789   : > { %3945 = vrcp.f32 %v1506_v13  ;;  %v3858_v13 = vld [vmem:[#allocation6] sm:$0xff]  }
 0x78b   : > { %v1395_v15 = vpop.permute.xlu0 %1394  ;;  %v1622_v17 = vpop.xlane.xlu1 %1621 }
 0x78c   : > { %v1400_v16 = vsel %vm1284_vm4, %v1395_v15, 0  ;;  %3947 = vrcp.f32 %v1622_v17  ;;  %v3859_v15 = vld [vmem:[#allocation8 + $0x30] ss:$8 sps:$4 sm:$0xff]   ;;  %v3865_v17 = vld [vmem:[#allocation8 + $0x44] ss:$8 sps:$4 sm:$0xff]  }
 0x78d   : > { %3520 = vmatpush3.bf16.msra.mxu1 %v1400_v16  ;;  %v3862_v16 = vld [vmem:[#allocation6 + $0x8] sm:$0xff]  }
 0x78e   : > { %3531 = vmatprep.subr.bf16.mxu1 %v4357_v8 }
 0x78f   : > { %v1511_v20 = vpop.permute.xlu1 %1510 }
 0x790   : > { %v1516_v24 = vsel %vm1284_vm4, %v1511_v20, 0  ;;  %v3869_v20 = vld [vmem:[#allocation8 + $0x54] ss:$8 sps:$4 sm:$0xff]  }
 0x792   : > { %v3944_v18 = vpop.eup %3943 }
 0x793   : > { %v1391_v19 = vmul.f32 %v3944_v18, %v3940_v9  ;;  %v3946_v23 = vpop.eup %3945  ;;  %v1627_v25 = vpop.permute.xlu1 %1626  ;;  %v3863_v18 = vld [vmem:[#allocation8 + $0x40] ss:$8 sps:$4 sm:$0xff]  }
 0x794   : > { %v1508_v5 = vmul.f32 %v3946_v23, %v3938_v6  ;;  %v1632_v28 = vsel %vm1284_vm4, %v1627_v25, 0  ;;  %v3852_v6 = vld [vmem:[#allocation8 + $0x10] ss:$8 sps:$4 sm:$0xff]   ;;  %v3874_v25 = vld [vmem:[#allocation6 + $0x20] sm:$0xff]  }
 0x795   : > { %v1392_v21 = vpack.c.bf16 %v1391_v19, %v1391_v19  ;;  %v3866_v19 = vld [vmem:[#allocation6 + $0x10] sm:$0xff]   ;;  %v3870_v23 = vld [vmem:[#allocation6 + $0x18] sm:$0xff]  }
 0x796   : > { %v1509_v26 = vpack.c.bf16 %v1508_v5, %v1508_v5  ;;  %v3948_v27 = vpop.eup %3947  ;;  %v3871_v5 = vld [vmem:[#allocation8 + $0x60] ss:$8 sps:$4 sm:$0xff]  }
 0x797   : > { %3522 = vmatmul.mubr.msk.bf16.vlgmr.msra.gmra.mrb[16].mxu1 %vm1268_vm5, %v1392_v21  ;;  %v1624_v29 = vmul.f32 %v3948_v27, %v3942_v11  ;;  %v3857_v11 = vld [vmem:[#allocation8 + $0x24] ss:$8 sps:$4 sm:$0xff]   ;;  %v3867_v21 = vld [vmem:[#allocation8 + $0x50] ss:$8 sps:$4 sm:$0xff]  }
 0x798   : > { %3532 = vmatpush3.bf16.msra.mxu1 %v1516_v24  ;;  %3533 = vmatprep.mubr.msk.bf16.mxu1 %vm4359_vm0, %v4357_v8  ;;  %v3873_v24 = vld [vmem:[#allocation8 + $0x64] ss:$8 sps:$4 sm:$0xff]   ;;  %v3875_v27 = vld [vmem:[#allocation8 + $0x70] ss:$8 sps:$4 sm:$0xff]  }
 0x799   : > { %3543 = vmatprep.subr.bf16.mxu1 %v4357_v8  ;;  %v1625_v30 = vpack.c.bf16 %v1624_v29, %v1624_v29  ;;  %v3878_v29 = vld [vmem:[#allocation6 + $0x28] sm:$0xff]  }
 0x79f   : > { %3534 = vmatmul.mubr.msk.bf16.vlgmr.msra.gmra.mrb[20].mxu1 %vm1268_vm5, %v1509_v26  ;;  %v3877_v26 = vld [vmem:[#allocation8 + $0x74] ss:$8 sps:$4 sm:$0xff]  }
 0x7a0   : > { %3544 = vmatpush3.bf16.msra.mxu1 %v1632_v28  ;;  %3545 = vmatprep.mubr.msk.bf16.mxu1 %vm4359_vm0, %v4357_v8  ;;  %v921_v28 = vld [vmem:[%s911_s12] sm:$0xff] }
 0x7a1   : > { %3569 = vmatprep.subr.bf16.mxu1 %v4357_v8 }
 0x7a7   : > { %3546 = vmatmul.mubr.msk.bf16.vlgmr.msra.gmra.mrb[24].mxu1 %vm1268_vm5, %v1625_v30  ;;  %v1940_v30 = vpack.c.bf16 %v921_v28, %v921_v28 }
 0x7a8   : > { %3585 = vmatprep.mubr.msk.bf16.mxu1 %vm4359_vm0, %v4357_v8  ;;  %3570 = vmatpush3.bf16.msra.mxu1 %v3858_v13  ;;  %v3334_v13 = vld [vmem:[%s918_s25] ss:$0 sm:$0xff]  ;;  %s4257_s25 = sshll.u32 %s4363_s6, 4  ;;  %s4258_s25 = int_to_ptr.vmem [resolvable:$false] %s4257_s25 }
 0x7a9   : > { %3571 = vmatprep.subr.bf16.mxu1 %v4357_v8  ;;  %s4259_s24 = scalar_lea.vmem %s4258_s25, 256 }
 0x7ac   : > { %3572 = vmatpush3.bf16.msra.mxu1 %v3862_v16 }
 0x7ad   : > { %3573 = vmatprep.subr.bf16.mxu1 %v4357_v8 }
 0x7b0   : > { %3574 = vmatpush3.bf16.msra.mxu1 %v3866_v19 }
 0x7b1   : > { %3575 = vmatprep.subr.bf16.mxu1 %v4357_v8 }
 0x7b4   : > { %3576 = vmatpush3.bf16.msra.mxu1 %v3870_v23 }
 0x7b5   : > { %3577 = vmatprep.subr.bf16.mxu1 %v4357_v8 }
 0x7b8   : > { %3578 = vmatpush3.bf16.msra.mxu1 %v3874_v25 }
 0x7b9   : > { %3579 = vmatprep.subr.bf16.mxu1 %v4357_v8 }
 0x7bc   : > { %3580 = vmatpush3.bf16.msra.mxu1 %v3878_v29 }
 0x7bd   : > { %3581 = vmatprep.subr.bf16.mxu1 %v4357_v8 }
 0x7c0   : > { %3582 = vmatpush3.bf16.msra.mxu1 %v3879_v31 }
 0x7c1   : > { %3583 = vmatprep.subr.bf16.mxu1 %v4357_v8 }
 0x7c4   : > { %3584 = vmatpush3.bf16.msra.mxu1 %v3880_v32 }
 0x7c5   : > { %3589 = vmatprep.subr.bf16.mxu1 %v4357_v8 }
 0x86a   : > { %v1436_v37 = vpop.f32.mrb[16].mxu1 }
 0x86b   : > { %1443 = vrot.lane.b32.xlu1 %v1436_v37, %s4361_s29  ;;  %v3523_v38 = vpop.f32.mrb[17].mxu1 }
 0x86c   : > { %v1439_v39 = vpop.f32.mrb[18].mxu1 }
 0x86d   : > { %v3524_v40 = vpop.f32.mrb[19].mxu1 }
 0x872   : > { %v1552_v43 = vpop.f32.mrb[20].mxu1 }
 0x873   : > { %1559 = vrot.lane.b32.xlu0 %v1552_v43, %s4362_s13  ;;  %v3535_v44 = vpop.f32.mrb[21].mxu1 }
 0x874   : > { %v1555_v45 = vpop.f32.mrb[22].mxu1  ;;  %v3308_v44 = vld [vmem:[%s5155_s11] ss:$0 sm:$0xff] }
 0x875   : > { %v3536_v46 = vpop.f32.mrb[23].mxu1 }
 0x87a   : > { %v1668_v47 = vpop.f32.mrb[24].mxu1 }
 0x87b   : > { %1675 = vrot.lane.b32.xlu1 %v1668_v47, %s4360_s18  ;;  %v3547_v49 = vpop.f32.mrb[25].mxu1 }
 0x87c   : > { %v1671_v50 = vpop.f32.mrb[26].mxu1  ;;  %v1957_v49 = vld [vmem:[%s5159_s15] sm:$0x3] }
 0x87d   : > { %v3548_v51 = vpop.f32.mrb[27].mxu1  ;;  %v1962_v50 = vrot.slane %v1957_v49, %v4843_v52 }
 0x8dd   : > { %v1444_v53 = vpop.permute.xlu1 %1443 }
 0x8de   : > { %1447 = vst.msk [vmem:[#allocation2] sm:$0xff] %vm1446_vm6, %v1444_v53 }
 0x8e5   : > { %v1560_v54 = vpop.permute.xlu0 %1559 }
 0x8e6   : > { %1563 = vst.msk [vmem:[#allocation2] sm:$0xff] %vm1562_vm7, %v1560_v54 }
 0x8ed   : > { %v1676_v55 = vpop.permute.xlu1 %1675 }
 0x8ee   : > { %1679 = vst.msk [vmem:[#allocation2] sm:$0xff] %vm1678_vm8, %v1676_v55 }
 0x8f5   : > { %v1680_v56 = vld [vmem:[#allocation2] sm:$0xff] }
 0x8f6   : > { %v1681_v57 = vpack.c.bf16 %v1680_v56, %v1680_v56 }
 0x8f8   : > { %3566 = vmatmul.mubr.bf16.vlgmr.msra.gmra.mrb[12].mxu0 %v1681_v57 }
 0x8f9   : > { %2081 = vmatprep.mubr.bf16.mxu0 %v4358_v22  ;;  %2050 = vmatpush1.bf16.msra.mxu0 %v3849_v2 }
 0x8fa   : > { %2051 = vmatprep.subr.bf16.mxu0 %v3854_v4 }
 0x8fd   : > { %2052 = vmatpush1.bf16.msra.mxu0 %v3852_v6 }
 0x8fe   : > { %2053 = vmatprep.subr.bf16.mxu0 %v3857_v11 }
 0x901   : > { %2054 = vmatpush1.bf16.msra.mxu0 %v3855_v12 }
 0x902   : > { %2055 = vmatprep.subr.bf16.mxu0 %v3861_v14 }
 0x905   : > { %2056 = vmatpush1.bf16.msra.mxu0 %v3859_v15 }
 0x906   : > { %2057 = vmatprep.subr.bf16.mxu0 %v3865_v17 }
 0x909   : > { %2058 = vmatpush1.bf16.msra.mxu0 %v3863_v18 }
 0x90a   : > { %2059 = vmatprep.subr.bf16.mxu0 %v3869_v20 }
 0x90d   : > { %2060 = vmatpush1.bf16.msra.mxu0 %v3867_v21 }
 0x90e   : > { %2061 = vmatprep.subr.bf16.mxu0 %v3873_v24 }
 0x911   : > { %2062 = vmatpush1.bf16.msra.mxu0 %v3871_v5 }
 0x912   : > { %2063 = vmatprep.subr.bf16.mxu0 %v3877_v26 }
 0x915   : > { %2064 = vmatpush1.bf16.msra.mxu0 %v3875_v27 }
 0x916   : > { %3613 = vmatprep.subr.bf16.mxu0 %v4357_v8 }
 0x918   : > { %2082 = vmatmul.mubr.bf16.vlgmr.msra.gmra.mrb[16].mxu0 %v1940_v30 }
 0x919   : > { %3615 = vmatprep.mubr.msk.bf16.mxu0 %vm4359_vm0, %v4357_v8 }
 0x9cb   : > { %v1787_v59 = vpop.f32.mrb[12].mxu0 }
 0x9cc   : > { %v1788_v60 = vadd.f32 %v3298_v58, %v1787_v59  ;;  %v3567_v61 = vpop.f32.mrb[13].mxu0  ;;  %v1966_v59 = vrot.slane %v1957_v49, %v4837_v48 }
 0x9cd   : > { %v1790_v62 = vpop.f32.mrb[14].mxu0  ;;  %v3309_v61 = vld [vmem:[%s5245_s4] ss:$0 sm:$0xff]  ;;  %s5251_s4 = smov %s5250_s28 }
 0x9ce   : > { %v4962_v63 = vadd.f32 %v1788_v60, %v4805_v0  ;;  %v3568_v1 = vpop.f32.mrb[15].mxu0 }
 0x9d0   : > { %1796 = vadd.xlane.f32.xlu0 %v4962_v63 }
 0x9eb   : > { %v2083_v51 = vpop.f32.mrb[16].mxu0 }
 0x9ec   : > { %v2084_v53 = vadd.f32 %v2083_v51, %v1962_v50  ;;  %v2085_v54 = vpop.f32.mrb[17].mxu0 }
 0x9ed   : > { %v2087_v55 = vpop.f32.mrb[18].mxu0  ;;  %v2086_v60 = vadd.f32 %v2085_v54, %v1966_v59 }
 0x9ee   : > { %v2092_v56 = vpack.c.bf16 %v2084_v53, %v2084_v53  ;;  %v2088_v57 = vpop.f32.mrb[19].mxu0 }
 0x9ef   : > { %v5004_v1 = vpack.c.bf16 %v2086_v60, %v2086_v60 }
 0x9f0   : > { %v2104_v58 = vsel %vm1221_vm3, %v2092_v56, 0 }
 0xa5d   : > { %v1797_v7 = vpop.xlane.xlu0 %1796 }
 0xa5e   : > { %v1798_v9 = vmul.f32 0.0078125, %v1797_v7 }
 0xa60   : > { %v4966_v10 = vsub.f32 %v4962_v63, %v1798_v9  ;;  %v2162_v9 = vsel %vm1284_vm4, %v5004_v1, 0 }
 0xa62   : > { %v1800_v0 = vmul.f32 %v4966_v10, %v4966_v10  ;;  %v1817_v42 = vmul.f32 %v3307_v41, %v4966_v10 }
 0xa64   : > { %1801 = vadd.xlane.f32.xlu1 %v1800_v0 }
 0xaf1   : > { %v1802_v33 = vpop.xlane.xlu1 %1801 }
 0xaf2   : > { %v1803_v34 = vmul.f32 0.007874016, %v1802_v33 }
 0xaf4   : > { %3949 = vrsqrt.f32 %v1803_v34  ;;  %vm1806_vm9 = vcmp.eq.f32.partialorder %v1803_v34, inf  ;;  %v1809_v37 = vand.u32 2147483648, %v1803_v34  ;;  %vm1808_vm10 = vcmp.eq.f32.partialorder %v1803_v34, 0.0 }
 0xafe   : > { %v3950_v35 = vpop.eup %3949 }
 0xaff   : > { %v1805_v36 = vmul.f32 %v3950_v35, %v1803_v34 }
 0xb01   : > { %v1807_v38 = vsel %vm1806_vm9, %v1803_v34, %v1805_v36 }
 0xb02   : > { %v1810_v39 = vsel %vm1808_vm10, %v1809_v37, %v1807_v38 }
 0xb03   : > { %v1818_v40 = vadd.f32 1e-06, %v1810_v39 }
 0xb05   : > { %3951 = vrcp.f32 %v1818_v40 }
 0xb0f   : > { %v3952_v43 = vpop.eup %3951 }
 0xb10   : > { %v1820_v45 = vmul.f32 %v3952_v43, %v1817_v42 }
 0xb12   : > { %v1827_v46 = vadd.f32 %v3308_v44, %v1820_v45 }
 0xb14   : > { %v1828_v47 = vpack.c.bf16 %v1827_v46, %v1827_v46 }
 0xb16   : > { %3586 = vmatmul.mubr.bf16.vlgmr.msra.gmra.mrb[28].mxu1 %v1828_v47 }
 0xb17   : > { %3591 = vmatprep.mubr.msk.bf16.mxu1 %vm4359_vm0, %v4357_v8  ;;  %3590 = vmatpush3.bf16.xpose.msra.mxu1 %v2104_v58 }
 0xb18   : > { %3595 = vmatprep.subr.bf16.mxu1 %v4357_v8 }
 0xbe9   : > { %v1934_v62 = vpop.f32.mrb[28].mxu1 }
 0xbea   : > { %v1935_v2 = vadd.f32 %v3309_v61, %v1934_v62  ;;  %v3587_v3 = vpop.f32.mrb[29].mxu1 }
 0xbeb   : > { %v1937_v4 = vpop.f32.mrb[30].mxu1 }
 0xbec   : > { %v2091_v6 = vpack.c.bf16 %v1935_v2, %v1935_v2  ;;  %v3588_v7 = vpop.f32.mrb[31].mxu1 }
 0xbee   : > { %2206 = vrot.lane.b32.xlu1 %v2091_v6, %s4360_s18  ;;  %3592 = vmatmul.mubr.msk.bf16.vlgmr.msra.gmra.mrb[32].mxu1 %vm1221_vm3, %v2091_v6 }
 0xbef   : > { %3596 = vmatpush3.bf16.msra.mxu1 %v2162_v9  ;;  %3597 = vmatprep.mubr.msk.bf16.mxu1 %vm4359_vm0, %v4357_v8 }
 0xbf0   : > { %3601 = vmatprep.subr.bf16.mxu1 %v4357_v8 }
 0xbf2   : > { %2325 = vrot.lane.b32.xlu1 %v2092_v56, %s4362_s13 }
 0xbf6   : > { %2323 = vrot.lane.b32.xlu1 %v2091_v6, %s4362_s13 }
 0xbfa   : > { %2438 = vrot.lane.b32.xlu1 %v2091_v6, %s4361_s29 }
 0xc60   : > { %v2207_v10 = vpop.permute.xlu1 %2206 }
 0xc64   : > { %v2326_v0 = vpop.permute.xlu1 %2325 }
 0xc65   : > { %v2331_v11 = vsel %vm1221_vm3, %v2326_v0, 0 }
 0xc66   : > { %3614 = vmatpush3.bf16.xpose.msra.mxu0 %v2331_v11 }
 0xc67   : > { %3625 = vmatprep.subr.bf16.mxu0 %v4357_v8 }
 0xc68   : > { %v2324_v12 = vpop.permute.xlu1 %2323 }
 0xc6c   : > { %v2439_v38 = vpop.permute.xlu1 %2438 }
 0xc6d   : > { %3616 = vmatmul.mubr.msk.bf16.vlgmr.msra.gmra.mrb[20].mxu0 %vm1221_vm3, %v2324_v12 }
 0xc6e   : > { %3627 = vmatprep.mubr.msk.bf16.mxu0 %vm4359_vm0, %v4357_v8 }
 0xcc1   : > { %v2140_v14 = vpop.f32.mrb[32].mxu1 }
 0xcc2   : > { %v2141_v15 = vadd.f32 %v3334_v13, %v2140_v14  ;;  %v3593_v16 = vpop.f32.mrb[33].mxu1 }
 0xcc3   : > { %v2143_v17 = vpop.f32.mrb[34].mxu1 }
 0xcc4   : > { %v3594_v18 = vpop.f32.mrb[35].mxu1  ;;  %v2146_v19 = vsel %vm1268_vm5, %v2141_v15, -inf }
 0xcc5   : > { %2147 = vmax.xlane.f32.xlu0 %v2146_v19 }
 0xd40   : > { %v2367_v20 = vpop.f32.mrb[20].mxu0 }
 0xd41   : > { %v2368_v21 = vadd.f32 %v3334_v13, %v2367_v20  ;;  %v3617_v23 = vpop.f32.mrb[21].mxu0 }
 0xd42   : > { %v2370_v24 = vpop.f32.mrb[22].mxu0 }
 0xd43   : > { %v3618_v5 = vpop.f32.mrb[23].mxu0  ;;  %v2373_v25 = vsel %vm1268_vm5, %v2368_v21, -inf }
 0xd44   : > { %2374 = vmax.xlane.f32.xlu1 %v2373_v25 }
 0xd52   : > { %v2148_v26 = vpop.xlane.xlu0 %2147 }
 0xd53   : > { %v2149_v27 = vsub.f32 %v2141_v15, %v2148_v26 }
 0xd55   : > { %v2150_v28 = vmul.f32 1.442695, %v2149_v27 }
 0xd57   : > { %3953 = vpow2.f32 %v2150_v28 }
 0xd61   : > { %v3954_v29 = vpop.eup %3953 }
 0xd62   : > { %v2152_v30 = vsel %vm1268_vm5, %v3954_v29, 0.0 }
 0xd63   : > { %2153 = vadd.xlane.f32.xlu0 %v2152_v30  ;;  %v3881_v30 = vld [vmem:[#allocation9] sm:$0xff]  }
 0xd79   : > { %2209 = vrot.lane.b32.xlu0 %v2092_v56, %s4360_s18 }
 0xd7d   : > { %2440 = vrot.lane.b32.xlu0 %v2092_v56, %s4361_s29 }
 0xdd1   : > { %v2375_v40 = vpop.xlane.xlu1 %2374 }
 0xdd2   : > { %v2376_v41 = vsub.f32 %v2368_v21, %v2375_v40  ;;  %v3888_v40 = vld [vmem:[#allocation9 + $0x38] sm:$0xff]  }
 0xdd4   : > { %v2377_v45 = vmul.f32 1.442695, %v2376_v41 }
 0xdf0   : > { %v2154_v31 = vpop.xlane.xlu0 %2153 }
 0xdf1   : > { %3955 = vrcp.f32 %v2154_v31  ;;  %v3882_v31 = vld [vmem:[#allocation9 + $0x8] sm:$0xff]  }
 0xdf2   : > { %3957 = vpow2.f32 %v2377_v45 }
 0xdf4   : > { %v2210_v32 = vpop.permute.xlu0 %2209 }
 0xdf5   : > { %v2215_v39 = vsel %vm1221_vm3, %v2210_v32, 0  ;;  %v3883_v32 = vld [vmem:[#allocation9 + $0x10] sm:$0xff]  }
 0xdf8   : > { %v2441_v33 = vpop.permute.xlu0 %2440 }
 0xdf9   : > { %v2446_v34 = vsel %vm1221_vm3, %v2441_v33, 0  ;;  %v3884_v33 = vld [vmem:[#allocation9 + $0x18] sm:$0xff]  }
 0xdfa   : > { %3626 = vmatpush3.bf16.xpose.msra.mxu0 %v2446_v34  ;;  %v3885_v34 = vld [vmem:[#allocation9 + $0x20] sm:$0xff]  }
 0xdfb   : > { %v3956_v35 = vpop.eup %3955  ;;  %3637 = vmatprep.subr.bf16.mxu0 %v4357_v8 }
 0xdfc   : > { %v2156_v36 = vmul.f32 %v3956_v35, %v3954_v29  ;;  %v3958_v61 = vpop.eup %3957  ;;  %v3886_v35 = vld [vmem:[#allocation9 + $0x28] sm:$0xff]  }
 0xdfd   : > { %v2379_v62 = vsel %vm1268_vm5, %v3958_v61, 0.0 }
 0xdfe   : > { %v2157_v37 = vpack.c.bf16 %v2156_v36, %v2156_v36 }
 0xe00   : > { %3598 = vmatmul.mubr.msk.bf16.vlgmr.msra.gmra.mrb[36].mxu1 %vm1268_vm5, %v2157_v37 }
 0xe01   : > { %3602 = vmatpush3.bf16.xpose.msra.mxu1 %v2215_v39  ;;  %3628 = vmatmul.mubr.msk.bf16.vlgmr.msra.gmra.mrb[24].mxu0 %vm1221_vm3, %v2439_v38  ;;  %v3887_v39 = vld [vmem:[#allocation9 + $0x30] sm:$0xff]  }
 0xe02   : > { %3603 = vmatprep.mubr.msk.bf16.mxu1 %vm4359_vm0, %v4357_v8  ;;  %3607 = vmatprep.subr.bf16.mxu1 %v4357_v8 }
 0xe03   : > { %3653 = vmatprep.mubr.msk.bf16.mxu0 %vm4359_vm0, %v4357_v8  ;;  %3638 = vmatpush3.bf16.msra.mxu0 %v3881_v30  ;;  %v3923_v30 = vld [vmem:[#allocation17 + $0x68] sm:$0xff]  }
 0xe04   : > { %3639 = vmatprep.subr.bf16.mxu0 %v4357_v8 }
 0xe07   : > { %3640 = vmatpush3.bf16.msra.mxu0 %v3882_v31  ;;  %v3924_v31 = vld [vmem:[#allocation17 + $0x28] sm:$0xff]  }
 0xe08   : > { %3604 = vmatmul.mubr.msk.bf16.vlgmr.msra.gmra.mrb[40].mxu1 %vm1221_vm3, %v2207_v10  ;;  %3641 = vmatprep.subr.bf16.mxu0 %v4357_v8 }
 0xe09   : > { %3609 = vmatprep.mubr.msk.bf16.mxu1 %vm4359_vm0, %v4357_v8 }
 0xe0b   : > { %3642 = vmatpush3.bf16.msra.mxu0 %v3883_v32 }
 0xe0c   : > { %3643 = vmatprep.subr.bf16.mxu0 %v4357_v8 }
 0xe0f   : > { %3644 = vmatpush3.bf16.msra.mxu0 %v3884_v33 }
 0xe10   : > { %3645 = vmatprep.subr.bf16.mxu0 %v4357_v8 }
 0xe13   : > { %3646 = vmatpush3.bf16.msra.mxu0 %v3885_v34 }
 0xe14   : > { %3647 = vmatprep.subr.bf16.mxu0 %v4357_v8 }
 0xe17   : > { %3648 = vmatpush3.bf16.msra.mxu0 %v3886_v35 }
 0xe18   : > { %3649 = vmatprep.subr.bf16.mxu0 %v4357_v8 }
 0xe1b   : > { %3650 = vmatpush3.bf16.msra.mxu0 %v3887_v39  ;;  %v3352_v39 = vld [vmem:[#allocation12] ss:$0 sm:$0xff] }
 0xe1c   : > { %3651 = vmatprep.subr.bf16.mxu0 %v4357_v8 }
 0xe1f   : > { %3652 = vmatpush3.bf16.msra.mxu0 %v3888_v40 }
 0xed3   : > { %v2198_v42 = vpop.f32.mrb[36].mxu1 }
 0xed4   : > { %2204 = vst.msk [vmem:[#allocation2] sm:$0xff] %vm1221_vm3, %v2198_v42  ;;  %v3599_v43 = vpop.f32.mrb[37].mxu1  ;;  %v2482_v44 = vpop.f32.mrb[24].mxu0 }
 0xed5   : > { %v2201_v46 = vpop.f32.mrb[38].mxu1  ;;  %v3629_v47 = vpop.f32.mrb[25].mxu0  ;;  %v2483_v57 = vadd.f32 %v3334_v13, %v2482_v44 }
 0xed6   : > { %v3600_v49 = vpop.f32.mrb[39].mxu1  ;;  %v2485_v50 = vpop.f32.mrb[26].mxu0 }
 0xed7   : > { %v3630_v51 = vpop.f32.mrb[27].mxu0  ;;  %v2488_v60 = vsel %vm1268_vm5, %v2483_v57, -inf }
 0xedb   : > { %v2251_v53 = vpop.f32.mrb[40].mxu1 }
 0xedc   : > { %v2252_v54 = vadd.f32 %v3334_v13, %v2251_v53  ;;  %v3605_v55 = vpop.f32.mrb[41].mxu1 }
 0xedd   : > { %v2254_v56 = vpop.f32.mrb[42].mxu1  ;;  %v3343_v55 = vld [vmem:[#allocation11] ss:$0 sm:$0xff] }
 0xede   : > { %v3606_v58 = vpop.f32.mrb[43].mxu1  ;;  %v2257_v59 = vsel %vm1268_vm5, %v2252_v54, -inf }
 0xedf   : > { %2258 = vmax.xlane.f32.xlu0 %v2257_v59 }
 0xee3   : > { %2489 = vmax.xlane.f32.xlu0 %v2488_v60 }
 0xee7   : > { %2380 = vadd.xlane.f32.xlu0 %v2379_v62 }
 0xf6c   : > { %v2259_v2 = vpop.xlane.xlu0 %2258 }
 0xf6d   : > { %v2260_v3 = vsub.f32 %v2252_v54, %v2259_v2 }
 0xf6f   : > { %v2261_v4 = vmul.f32 1.442695, %v2260_v3 }
 0xf70   : > { %v2490_v6 = vpop.xlane.xlu0 %2489 }
 0xf71   : > { %3959 = vpow2.f32 %v2261_v4  ;;  %v2491_v7 = vsub.f32 %v2483_v57, %v2490_v6  ;;  %v3891_v6 = vld [vmem:[#allocation15 + $0x4] ss:$8 sps:$4 sm:$0xff]  }
 0xf73   : > { %v2492_v9 = vmul.f32 1.442695, %v2491_v7  ;;  %v3889_v7 = vld [vmem:[#allocation15] ss:$8 sps:$4 sm:$0xff]  }
 0xf74   : > { %v2381_v13 = vpop.xlane.xlu0 %2380 }
 0xf75   : > { %3961 = vpow2.f32 %v2492_v9  ;;  %v3894_v9 = vld [vmem:[#allocation15 + $0x14] ss:$8 sps:$4 sm:$0xff]  }
 0xf7b   : > { %v3960_v10 = vpop.eup %3959 }
 0xf7c   : > { %v2263_v0 = vsel %vm1268_vm5, %v3960_v10, 0.0 }
 0xf7d   : > { %2264 = vadd.xlane.f32.xlu0 %v2263_v0  ;;  %v3895_v0 = vld [vmem:[#allocation15 + $0x20] ss:$8 sps:$4 sm:$0xff]  }
 0xf7f   : > { %v3962_v11 = vpop.eup %3961 }
 0xf80   : > { %v2494_v12 = vsel %vm1268_vm5, %v3962_v11, 0.0 }
 0xf81   : > { %2495 = vadd.xlane.f32.xlu1 %v2494_v12  ;;  %v3898_v12 = vld [vmem:[#allocation15 + $0x30] ss:$8 sps:$4 sm:$0xff]  }
 0xf92   : > { %2385 = vrot.lane.b32.xlu1 %v5004_v1, %s4362_s13 }
 0xf93   : > { %2270 = vrot.lane.b32.xlu0 %v5004_v1, %s4360_s18 }
 0xf96   : > { %2500 = vrot.lane.b32.xlu1 %v5004_v1, %s4361_s29 }
0x100a   : > { %v2265_v14 = vpop.xlane.xlu0 %2264 }
0x100b   : > { %3963 = vrcp.f32 %v2265_v14  ;;  %v3903_v14 = vld [vmem:[#allocation15 + $0x44] ss:$8 sps:$4 sm:$0xff]  }
0x100c   : > { %3965 = vrcp.f32 %v2381_v13  ;;  %v3901_v13 = vld [vmem:[#allocation15 + $0x40] ss:$8 sps:$4 sm:$0xff]  }
0x100e   : > { %v2271_v15 = vpop.permute.xlu0 %2270  ;;  %v2496_v17 = vpop.xlane.xlu1 %2495 }
0x100f   : > { %v2276_v16 = vsel %vm1284_vm4, %v2271_v15, 0  ;;  %3967 = vrcp.f32 %v2496_v17  ;;  %v3906_v15 = vld [vmem:[#allocation15 + $0x54] ss:$8 sps:$4 sm:$0xff]   ;;  %v3909_v17 = vld [vmem:[#allocation15 + $0x64] ss:$8 sps:$4 sm:$0xff]  }
0x1010   : > { %3608 = vmatpush3.bf16.msra.mxu1 %v2276_v16  ;;  %v3904_v16 = vld [vmem:[#allocation15 + $0x50] ss:$8 sps:$4 sm:$0xff]  }
0x1011   : > { %3619 = vmatprep.subr.bf16.mxu1 %v4357_v8 }
0x1012   : > { %v2386_v20 = vpop.permute.xlu1 %2385 }
0x1013   : > { %v2391_v24 = vsel %vm1284_vm4, %v2386_v20, 0  ;;  %v3910_v20 = vld [vmem:[#allocation15 + $0x70] ss:$8 sps:$4 sm:$0xff]  }
0x1015   : > { %v3964_v18 = vpop.eup %3963 }
0x1016   : > { %v2267_v19 = vmul.f32 %v3964_v18, %v3960_v10  ;;  %v3966_v23 = vpop.eup %3965  ;;  %v2501_v5 = vpop.permute.xlu1 %2500  ;;  %v3892_v10 = vld [vmem:[#allocation15 + $0x10] ss:$8 sps:$4 sm:$0xff]   ;;  %v3907_v18 = vld [vmem:[#allocation15 + $0x60] ss:$8 sps:$4 sm:$0xff]  }
0x1017   : > { %v2383_v1 = vmul.f32 %v3966_v23, %v3958_v61  ;;  %v2506_v27 = vsel %vm1284_vm4, %v2501_v5, 0  ;;  %v3914_v23 = vld [vmem:[#allocation17] sm:$0xff]   ;;  %v3917_v5 = vld [vmem:[#allocation17 + $0x50] sm:$0xff]  }
0x1018   : > { %v2268_v21 = vpack.c.bf16 %v2267_v19, %v2267_v19  ;;  %v3912_v19 = vld [vmem:[#allocation15 + $0x74] ss:$8 sps:$4 sm:$0xff]  }
0x1019   : > { %v2384_v25 = vpack.c.bf16 %v2383_v1, %v2383_v1  ;;  %v3968_v26 = vpop.eup %3967  ;;  %v3916_v1 = vld [vmem:[#allocation17 + $0x8] sm:$0xff]  }
0x101a   : > { %3610 = vmatmul.mubr.msk.bf16.vlgmr.msra.gmra.mrb[44].mxu1 %vm1268_vm5, %v2268_v21  ;;  %v2498_v28 = vmul.f32 %v3968_v26, %v3962_v11  ;;  %v3900_v11 = vld [vmem:[#allocation15 + $0x34] ss:$8 sps:$4 sm:$0xff]   ;;  %v3913_v21 = vld [vmem:[#allocation17 + $0x40] sm:$0xff]  }
0x101b   : > { %3620 = vmatpush3.bf16.msra.mxu1 %v2391_v24  ;;  %3621 = vmatprep.mubr.msk.bf16.mxu1 %vm4359_vm0, %v4357_v8  ;;  %v3915_v24 = vld [vmem:[#allocation17 + $0x48] sm:$0xff]   ;;  %v3919_v26 = vld [vmem:[#allocation17 + $0x58] sm:$0xff]  }
0x101c   : > { %3631 = vmatprep.subr.bf16.mxu1 %v4357_v8  ;;  %v2499_v29 = vpack.c.bf16 %v2498_v28, %v2498_v28  ;;  %3459 = vmatprep.subr.bf16.mxu0 %v3913_v21  ;;  %v3921_v28 = vld [vmem:[#allocation17 + $0x60] sm:$0xff]  }
0x1022   : > { %3622 = vmatmul.mubr.msk.bf16.vlgmr.msra.gmra.mrb[48].mxu1 %vm1268_vm5, %v2384_v25  ;;  %v3918_v25 = vld [vmem:[#allocation17 + $0x10] sm:$0xff]  }
0x1023   : > { %3632 = vmatpush3.bf16.msra.mxu1 %v2506_v27  ;;  %3633 = vmatprep.mubr.msk.bf16.mxu1 %vm4359_vm0, %v4357_v8  ;;  %v3920_v27 = vld [vmem:[#allocation17 + $0x18] sm:$0xff]  }
0x1024   : > { %2810 = vmatprep.subr.bf16.mxu1 %v3891_v6  ;;  %v3370_v6 = vld [vmem:[#allocation18] ss:$0 sm:$0xff] }
0x102a   : > { %3634 = vmatmul.mubr.msk.bf16.vlgmr.msra.gmra.mrb[52].mxu1 %vm1268_vm5, %v2499_v29  ;;  %v3922_v29 = vld [vmem:[#allocation17 + $0x20] sm:$0xff]  }
0x102b   : > { %2842 = vmatprep.mubr.bf16.mxu1 %v4358_v22  ;;  %2811 = vmatpush1.bf16.msra.mxu1 %v3889_v7 }
0x102c   : > { %2812 = vmatprep.subr.bf16.mxu1 %v3894_v9 }
0x102f   : > { %2813 = vmatpush1.bf16.msra.mxu1 %v3892_v10 }
0x10ed   : > { %v2312_v22 = vpop.f32.mrb[44].mxu1 }
0x10ee   : > { %2319 = vrot.lane.b32.xlu1 %v2312_v22, %s4361_s29  ;;  %v3611_v36 = vpop.f32.mrb[45].mxu1  ;;  %s5247_s29 = sld [smem:[#allocation49_spill]] }
0x10ef   : > { %v2315_v37 = vpop.f32.mrb[46].mxu1 }
0x10f0   : > { %v3612_v38 = vpop.f32.mrb[47].mxu1 }
0x10f5   : > { %v2427_v41 = vpop.f32.mrb[48].mxu1 }
0x10f6   : > { %2434 = vrot.lane.b32.xlu0 %v2427_v41, %s4362_s13  ;;  %v3623_v42 = vpop.f32.mrb[49].mxu1  ;;  %s5248_s13 = sld [smem:[#allocation29_spill]] }
0x10f7   : > { %v2430_v43 = vpop.f32.mrb[50].mxu1  ;;  %v3353_v42 = vld [vmem:[#allocation14] ss:$0 sm:$0xff] }
0x10f8   : > { %v3624_v44 = vpop.f32.mrb[51].mxu1 }
0x10fc   : > { %s901_s12 = sand.u32 1, %s5248_s13  }
0x10fd   : > { %v2542_v45 = vpop.f32.mrb[52].mxu1  ;;  %s3260_s8 = sshll.u32 %s901_s12, 3  ;;  %s3033_s16 = scalar_lea.sflag [#allocation5], %s901_s12 }
0x10fe   : > { %2549 = vrot.lane.b32.xlu1 %v2542_v45, %s4360_s18  ;;  %v3635_v46 = vpop.f32.mrb[53].mxu1  ;;  %s903_s2 = scalar_lea.vmem [#allocation20], %s3260_s8 }
0x10ff   : > { %v2545_v47 = vpop.f32.mrb[54].mxu1  ;;  %v3925_v46 = vld [vmem:[#allocation17 + $0x70] sm:$0xff]   ;;  %s3046_s5 = sshll.u32 %s903_s2, 4  ;;  %s5104_s5 = int_to_ptr.vmem [resolvable:$true] %s3046_s5 }
0x1100   : > { %v3636_v49 = vpop.f32.mrb[55].mxu1  ;;  %v3926_v47 = vld [vmem:[#allocation17 + $0x30] sm:$0xff]   ;;  %s4253_s3 = scalar_lea.vmem %s5104_s5, 128  ;;  %p4260_p3 = scmp.lt.s32.totalorder %s5104_s5, %s4258_s25 }
0x1101   : > { %v3927_v49 = vld [vmem:[#allocation17 + $0x78] sm:$0xff]   ;;  %p4254_p5 = scmp.ne.s32.totalorder %s5104_s5, %s4253_s3  ;;  %p4261_p4 = scmp.lt.s32.totalorder %s4259_s24, %s4253_s3 }
0x1103   : > { %p4255_p0 = pnand %p4254_p5, %p5252_p10  ;;  %p4262_p12 = por %p4261_p4, %p4260_p3 }
0x1105   : > { %p4256_p2 = pneg %p4255_p0 }
0x1107   : > { %p4263_p7 = pnand %p4262_p12, %p4256_p2 }
0x1160   : > { %v2320_v50 = vpop.permute.xlu1 %2319 }
0x1161   : > { %2322 = vst.msk [vmem:[#allocation2] sm:$0xff] %vm1446_vm6, %v2320_v50  ;;  %v3928_v50 = vld [vmem:[#allocation17 + $0x38] sm:$0xff]  }
0x1168   : > { %v2435_v51 = vpop.permute.xlu0 %2434 }
0x1169   : > { %2437 = vst.msk [vmem:[#allocation2] sm:$0xff] %vm1562_vm7, %v2435_v51  ;;  %v2718_v51 = vld [vmem:[%s5247_s29] sm:$0x3] }
0x1170   : > { %v2550_v8 = vpop.permute.xlu1 %2549 }
0x1171   : > { %2552 = vst.msk [vmem:[#allocation2] sm:$0xff] %vm1678_vm8, %v2550_v8  ;;  %v2723_v8 = vrot.slane %v2718_v51, %v4843_v52 }
0x1178   : > { %v2553_v53 = vld [vmem:[#allocation2] sm:$0xff] }
0x1179   : > { %v2554_v54 = vpack.c.bf16 %v2553_v53, %v2553_v53  ;;  %v2727_v53 = vrot.slane %v2718_v51, %v4837_v48 }
0x117b   : > { %3654 = vmatmul.mubr.bf16.vlgmr.msra.gmra.mrb[28].mxu0 %v2554_v54 }
0x117c   : > { %3460 = vmatpush3.bf16.msra.mxu0 %v3914_v23 }
0x117d   : > { %3461 = vmatprep.subr.bf16.mxu0 %v3915_v24 }
0x1180   : > { %3462 = vmatpush3.bf16.msra.mxu0 %v3916_v1 }
0x1181   : > { %3463 = vmatprep.subr.bf16.mxu0 %v3917_v5 }
0x1184   : > { %3464 = vmatpush3.bf16.msra.mxu0 %v3918_v25 }
0x1185   : > { %3465 = vmatprep.subr.bf16.mxu0 %v3919_v26 }
0x1188   : > { %3466 = vmatpush3.bf16.msra.mxu0 %v3920_v27 }
0x1189   : > { %3467 = vmatprep.subr.bf16.mxu0 %v3921_v28 }
0x118c   : > { %3468 = vmatpush3.bf16.msra.mxu0 %v3922_v29 }
0x118d   : > { %3469 = vmatprep.subr.bf16.mxu0 %v3923_v30 }
0x1190   : > { %3470 = vmatpush3.bf16.msra.mxu0 %v3924_v31 }
0x1191   : > { %3471 = vmatprep.subr.bf16.mxu0 %v3925_v46 }
0x1194   : > { %3472 = vmatpush3.bf16.msra.mxu0 %v3926_v47 }
0x1195   : > { %3473 = vmatprep.subr.bf16.mxu0 %v3927_v49 }
0x1198   : > { %3474 = vmatpush3.bf16.msra.mxu0 %v3928_v50 }
0x124e   : > { %v2660_v56 = vpop.f32.mrb[28].mxu0 }
0x124f   : > { %v2661_v57 = vadd.f32 %v3343_v55, %v2660_v56  ;;  %v3655_v58 = vpop.f32.mrb[29].mxu0 }
0x1250   : > { %v2663_v59 = vpop.f32.mrb[30].mxu0 }
0x1251   : > { %v5082_v60 = vadd.f32 %v2661_v57, %v4962_v63  ;;  %v3656_v61 = vpop.f32.mrb[31].mxu0  ;;  %v3897_v63 = vld [vmem:[#allocation15 + $0x24] ss:$8 sps:$4 sm:$0xff]  }
0x1252   : > { %2814 = vmatprep.subr.bf16.mxu1 %v3897_v63 }
0x1253   : > { %2669 = vadd.xlane.f32.xlu0 %v5082_v60  ;;  %2815 = vmatpush1.bf16.msra.mxu1 %v3895_v0 }
0x1254   : > { %2816 = vmatprep.subr.bf16.mxu1 %v3900_v11 }
0x1257   : > { %2817 = vmatpush1.bf16.msra.mxu1 %v3898_v12 }
0x1258   : > { %2818 = vmatprep.subr.bf16.mxu1 %v3903_v14 }
0x125b   : > { %2819 = vmatpush1.bf16.msra.mxu1 %v3901_v13 }
0x125c   : > { %2820 = vmatprep.subr.bf16.mxu1 %v3906_v15 }
0x125f   : > { %2821 = vmatpush1.bf16.msra.mxu1 %v3904_v16 }
0x1260   : > { %2822 = vmatprep.subr.bf16.mxu1 %v3909_v17 }
0x1263   : > { %2823 = vmatpush1.bf16.msra.mxu1 %v3907_v18 }
0x1264   : > { %2824 = vmatprep.subr.bf16.mxu1 %v3912_v19 }
0x1267   : > { %2825 = vmatpush1.bf16.msra.mxu1 %v3910_v20 }
0x12e0   : > { %v2670_v62 = vpop.xlane.xlu0 %2669 }
0x12e1   : > { %v2671_v2 = vmul.f32 0.0078125, %v2670_v62 }
0x12e3   : > { %v5086_v3 = vsub.f32 %v5082_v60, %v2671_v2 }
0x12e5   : > { %v2673_v4 = vmul.f32 %v5086_v3, %v5086_v3  ;;  %v2690_v40 = vmul.f32 %v3352_v39, %v5086_v3 }
0x12e7   : > { %2674 = vadd.xlane.f32.xlu1 %v2673_v4 }
0x1374   : > { %v2675_v32 = vpop.xlane.xlu1 %2674 }
0x1375   : > { %v2676_v33 = vmul.f32 0.007874016, %v2675_v32 }
0x1377   : > { %3969 = vrsqrt.f32 %v2676_v33  ;;  %vm2679_vm11 = vcmp.eq.f32.partialorder %v2676_v33, inf  ;;  %v2682_v22 = vand.u32 2147483648, %v2676_v33  ;;  %vm2681_vm12 = vcmp.eq.f32.partialorder %v2676_v33, 0.0 }
0x1381   : > { %v3970_v34 = vpop.eup %3969 }
0x1382   : > { %v2678_v35 = vmul.f32 %v3970_v34, %v2676_v33 }
0x1384   : > { %v2680_v36 = vsel %vm2679_vm11, %v2676_v33, %v2678_v35 }
0x1385   : > { %v2683_v37 = vsel %vm2681_vm12, %v2682_v22, %v2680_v36 }
0x1386   : > { %v2691_v38 = vadd.f32 1e-06, %v2683_v37 }
0x1388   : > { %3971 = vrcp.f32 %v2691_v38 }
0x1392   : > { %v3972_v41 = vpop.eup %3971 }
0x1393   : > { %v2693_v43 = vmul.f32 %v3972_v41, %v2690_v40 }
0x1395   : > { %v2700_v44 = vadd.f32 %v3353_v42, %v2693_v43 }
0x1397   : > { %v2701_v45 = vpack.c.bf16 %v2700_v44, %v2700_v44 }
0x1399   : > { %2843 = vmatmul.mubr.bf16.vlgmr.msra.gmra.mrb[56].mxu1 %v2701_v45 }
0x146c   : > { %v2844_v54 = vpop.f32.mrb[56].mxu1 }
0x146d   : > { %v2845_v55 = vadd.f32 %v2844_v54, %v2723_v8  ;;  %v2846_v56 = vpop.f32.mrb[57].mxu1 }
0x146e   : > { %v2847_v57 = vadd.f32 %v2846_v56, %v2727_v53  ;;  %v2848_v58 = vpop.f32.mrb[58].mxu1 }
0x146f   : > { %v2851_v59 = vmax.f32 %v2845_v55, 0.0  ;;  %v2849_v61 = vpop.f32.mrb[59].mxu1 }
0x1470   : > { %v2852_v62 = vmax.f32 %v2847_v57, 0.0 }
0x1471   : > { %v2853_v3 = vpack.c.bf16 %v2851_v59, %v2851_v59 }
0x1472   : > { %v2854_v2 = vpack.c.bf16 %v2852_v62, %v2852_v62 }
0x1474   : > { %3022 = vmatprep.mubr.bf16.mxu0 %v2854_v2 }
0x1475   : > { %3023 = vmatmul.mubr.bf16.vlgmr.msra.gmra.mrb[32].mxu0 %v2853_v3 }
0x1548   : > { %v3475_v4 = vpop.f32.mrb[32].mxu0 }
0x1549   : > { %v3476_v52 = vpop.f32.mrb[33].mxu0 }
0x154a   : > { %v3477_v48 = vadd.f32 %v3476_v52, %v3475_v4  ;;  %v3478_v7 = vpop.f32.mrb[34].mxu0 }
0x154b   : > { %v3479_v9 = vpop.f32.mrb[35].mxu0 }
0x154c   : > { %v3025_v10 = vadd.f32 %v3477_v48, %v3370_v6 }
0x154e   : > { %v3030_v63 = vadd.f32 %v3025_v10, %v5082_v60 }
0x1550   : > { %3031 = vst [vmem:[%s903_s2] sm:$0xff] %v3030_v63 }
0x1551   : > { %4266 = shalt.err (!%p4263_p7)
}
0x1552   : > { %s4267_s18 = scalar_lea.hbm %s5102_s21, 128  ;;  %s4271_s12 = scalar_lea.hbm %s5251_s4, 256 }
0x1553   : > { %p4268_p8 = scmp.ne.s32.totalorder %s5102_s21, %s4267_s18  ;;  %p4272_p1 = scmp.lt.u32.totalorder %s5102_s21, %s5251_s4 }
0x1554   : > { %p4273_p6 = scmp.lt.u32.totalorder %s4271_s12, %s4267_s18  ;;  %p4275_p5 = scmp.lt.u32.totalorder %s4267_s18, %s5102_s21 }
0x1555   : > { %p4269_p11 = pnand %p4268_p8, %p5252_p10 }
0x1556   : > { %p4274_p9 = por %p4273_p6, %p4272_p1 }
0x1557   : > { %p4270_p13 = pneg %p4269_p11 }
0x1558   : > { %p4276_p0 = por %p4275_p5, %p4274_p9 }
0x155a   : > { %p4277_p2 = pnand %p4276_p0, %p4270_p13 }
0x155c   : > { %4280 = shalt.err (!%p4277_p2)
}
0x155d   : > { %3697 = dma.vmem_to_hbm [thread:$0]  (%p5252_p10), %s5104_s5, 128, %s5102_s21, %s3033_s16  }
0x155e PF: > { %s5253_s2 = sld [smem:[#allocation31_spill]]  ;;  %s5254_s7 = sld [smem:[#allocation28_spill]] }
0x155f   : > { %s5255_s27 = sld [smem:[#allocation35_spill]] }
0x1564   : > { %p3754_p3 = scmp.ge.s32.totalorder %s5253_s2, 2  ;;  %s3058_s28 = sand.u32 1, %s5254_s7  }
0x1565   : > { %p5256_p4 = scmp.ne.s32.totalorder %s5255_s27, 0  ;;  %s3059_s3 = scalar_lea.sflag [#allocation5], %s3058_s28 }
0x1567   : > { %p3731_p12 = pnand %p3754_p3, %p5256_p4 }
0x1569   : > { %4322 = dma.done.wait (!%p3731_p12), %s3059_s3, 128  }
0x156a   : > { %4324 = vsyncadd (!%p3731_p12), %s3059_s3, 4294967168  ;;  %s5257_s28 = sld [smem:[#allocation32_spill]]  ;;  %s5258_s5 = sld [smem:[#allocation29_spill]] }
0x156b   : > { %s5259_s26 = sld [smem:[#allocation30_spill]]  ;;  %s5260_s27 = sld [smem:[#allocation33_spill]] }
0x1570   : > { %p40_p7 = scmp.ge.s32.totalorder %s5257_s28, 4  }
0x1572   :  { %42 = sbr.rel (!%p40_p7) target bundleno = 25 (0x19), region = 201 }
0x1579   :  { %3064 = vsyncpa [#allocation4], 1 }
0x157a   :  { %3066 = vsyncpa [#allocation4 + $0x1], 1 }
0x157b   :  { %3067 = vsyncpa [#allocation7], 1 }
0x157c   :  { %3068 = vsyncpa [#allocation10], 1 }
0x157d   :  { %3069 = vsyncpa [#allocation13], 1 }
0x157e   :  { %3070 = vsyncpa [#allocation16], 1 }
0x157f   :  { %3071 = vsyncpa [#allocation19], 1 }
0x1580   :  { %3072 = vsyncpa [#allocation5], 1 }
0x1581   :  { %3074 = vsyncpa [#allocation5 + $0x1], 1 }

</bundles_post_ra>
